<compile_context>
chip_gen: v7x
topology: tpu7x:2x2x1
jax: 0.10.0
libtpu: 0.0.40
codegen_flags: <defaults>
</compile_context>

<pallas_src>
import math
from functools import partial

import numpy as np
import jax
import jax.numpy as jnp
from jax import lax
from jax.experimental import pallas as pl
from jax.experimental.pallas import tpu as pltpu

_INV_SQRT2 = 0.7071067811865476
_BN_EPS = 1e-5
_LANE_TILE = 16384                   # pixel tile on the lane axis (block kernels)
_HEAD_TILE = 8192                    # smaller tile: caps the (128, tile) f32 temp
_VMEM_LIMIT = 64 * 1024 * 1024       # raised per review; actual use is ~10-20 MiB
_ACT_DTYPE = jnp.bfloat16            # activation-slab / matmul-weight dtype


def _gelu_exact(x):
    # Matches torch.nn.functional.gelu (default, erf-based), computed in f32.
    return 0.5 * x * (1.0 + lax.erf(x * _INV_SQRT2))


def _round_up(n, m):
    return ((n + m - 1) // m) * m


def _pick_tile(p, target):
    """Pick a lane tile: big (amortize per-step cost), 128-aligned when < P,
    and preferring >= 2 grid steps so v7x's 2 TensorCores both get work."""
    half = _round_up(max(1, (p + 1) // 2), 128)
    tile = min(target, half)
    if tile >= p:
        return p            # single full-extent block (always a legal block dim)
    return tile             # multiple of 128; last block is ragged (masked store)


def _compiler_params():
    return pltpu.CompilerParams(dimension_semantics=("parallel",),
                                vmem_limit_bytes=_VMEM_LIMIT)


# ----------------------------- Pallas kernels ------------------------------

def _make_pointwise_kernel(apply_gelu, has_res):
    # Lane-dense pointwise linear: (Cout, Cin) @ (Cin, tileP) [+ res] [+ gelu].
    if has_res:
        def kernel(x_ref, res_ref, w_ref, b_ref, o_ref):
            y = jnp.dot(w_ref[...], x_ref[...],
                        preferred_element_type=jnp.float32)
            y = y + b_ref[...] + res_ref[...].astype(jnp.float32)
            if apply_gelu:
                y = _gelu_exact(y)
            o_ref[...] = y.astype(o_ref.dtype)
    else:
        def kernel(x_ref, w_ref, b_ref, o_ref):
            y = jnp.dot(w_ref[...], x_ref[...],
                        preferred_element_type=jnp.float32)
            y = y + b_ref[...]
            if apply_gelu:
                y = _gelu_exact(y)
            o_ref[...] = y.astype(o_ref.dtype)
    return kernel


def pointwise_linear(x2d, w, b_col, res2d=None, *, apply_gelu=False,
                     out_dtype=_ACT_DTYPE, tile_target=_LANE_TILE):
    """y = w @ x2d (+ res2d) (+ gelu).  x2d: (Cin, P) with P on lanes."""
    cin, p = x2d.shape
    cout = w.shape[0]
    tile = _pick_tile(p, tile_target)
    grid = (pl.cdiv(p, tile),)
    in_specs = [pl.BlockSpec((cin, tile), lambda i: (0, i))]
    operands = [x2d]
    if res2d is not None:
        in_specs.append(pl.BlockSpec((cout, tile), lambda i: (0, i)))
        operands.append(res2d)
    in_specs += [pl.BlockSpec((cout, cin), lambda i: (0, 0)),
                 pl.BlockSpec((cout, 1), lambda i: (0, 0))]
    operands += [w, b_col]
    return pl.pallas_call(
        _make_pointwise_kernel(apply_gelu, res2d is not None),
        grid=grid,
        in_specs=in_specs,
        out_specs=pl.BlockSpec((cout, tile), lambda i: (0, i)),
        out_shape=jax.ShapeDtypeStruct((cout, p), out_dtype),
        compiler_params=_compiler_params(),
    )(*operands)


def _head_kernel(x_ref, w1_ref, b1_ref, w2_ref, b2_ref, o_ref):
    # fc1 -> gelu -> fc2 fused; the (128, tileP) intermediate never hits HBM.
    h = jnp.dot(w1_ref[...], x_ref[...], preferred_element_type=jnp.float32)
    h = _gelu_exact(h + b1_ref[...])
    y = jnp.dot(w2_ref[...], h.astype(_ACT_DTYPE),
                preferred_element_type=jnp.float32)
    o_ref[...] = (y + b2_ref[...]).astype(o_ref.dtype)


def head_fused(x2d, w1, b1, w2, b2, *, tile_target=_HEAD_TILE):
    c, p = x2d.shape
    c1, c2 = w1.shape[0], w2.shape[0]
    tile = _pick_tile(p, tile_target)
    grid = (pl.cdiv(p, tile),)
    return pl.pallas_call(
        _head_kernel,
        grid=grid,
        in_specs=[pl.BlockSpec((c, tile), lambda i: (0, i)),
                  pl.BlockSpec((c1, c), lambda i: (0, 0)),
                  pl.BlockSpec((c1, 1), lambda i: (0, 0)),
                  pl.BlockSpec((c2, c1), lambda i: (0, 0)),
                  pl.BlockSpec((c2, 1), lambda i: (0, 0))],
        out_specs=pl.BlockSpec((c2, tile), lambda i: (0, i)),
        out_shape=jax.ShapeDtypeStruct((c2, p), jnp.float32),
        compiler_params=_compiler_params(),
    )(x2d, w1, b1, w2, b2)


# --------------------- SpectralConv2d via truncated DFT --------------------

def _make_dft_mats(hp, wp, m1, m2):
    """Precompute truncated (I)DFT matrices that replicate
    rfft2 / irfft2 with norm='ortho' restricted to the kept modes."""
    wcol = np.arange(wp)[:, None]
    lcol = np.arange(m2)[None, :]
    tw = 2.0 * np.pi * wcol * lcol / wp                       # (Wp, m2)
    inv_sw = 1.0 / np.sqrt(wp)
    # forward real DFT along w: X = x @ (cos - i sin); stacked [cos | -sin]
    fw = np.concatenate([np.cos(tw), -np.sin(tw)], axis=1) * inv_sw   # (Wp, 2m2)
    # inverse real DFT along w (hermitian reconstruction): alpha-weighted Re()
    alpha = np.full((m2,), 2.0)
    alpha[0] = 1.0
    if wp % 2 == 0 and (m2 - 1) == wp // 2:                   # Nyquist column kept
        alpha[-1] = 1.0
    gw = np.concatenate([alpha[:, None] * np.cos(tw.T),
                         alpha[:, None] * np.sin(tw.T)], axis=0) * inv_sw  # (2m2, Wp)
    # complex DFT / IDFT along h restricted to the kept rows
    k1 = np.concatenate([np.arange(m1), np.arange(hp - m1, hp)])      # (2m1,)
    th = 2.0 * np.pi * np.arange(hp)[:, None] * k1[None, :] / hp      # (Hp, 2m1)
    inv_sh = 1.0 / np.sqrt(hp)
    fh = ((np.cos(th) - 1j * np.sin(th)) * inv_sh).astype(np.complex64)
    gh = ((np.cos(th.T) + 1j * np.sin(th.T)) * inv_sh).astype(np.complex64)
    return (jnp.asarray(fw, _ACT_DTYPE), jnp.asarray(fh),
            jnp.asarray(gh), jnp.asarray(gw, _ACT_DTYPE))


def spectral_conv_dft(slab_bf16, w_c, dft, *, b, hp, wp, m1, m2):
    """SpectralConv2d.forward (with the eval-mode BN scale already folded into
    w_c), computed as truncated-DFT matmuls instead of rfft2/irfft2.

    slab_bf16: (Cin, B*Hp*Wp) bf16 activations (channels-first, w fastest).
    w_c: (Cin, Cout, 2*m1, m2) complex64 spectral weights (weights1 stacked on
         top of weights2 along the row-mode axis).
    Returns x1 as a (Cout, B*Hp*Wp) bf16 slab.
    """
    # TODO(synk): these contractions (and the complex mode mixing below) could
    #             be fused into one Pallas kernel per layer; they are left as
    #             XLA MXU dots here since all intermediates are tiny and the
    #             big streams (slab read, x1 write) are touched exactly once.
    fw, fh, gh, gw = dft
    cin = slab_bf16.shape[0]
    cout = w_c.shape[1]
    x4 = slab_bf16.reshape(cin, b, hp, wp)
    # forward truncated real-DFT along w (bf16 in, f32 accumulate; small out)
    t1 = jnp.einsum('cbhw,wl->cbhl', x4, fw,
                    preferred_element_type=jnp.float32)        # (Cin,B,Hp,2m2)
    t1c = lax.complex(t1[..., :m2], t1[..., m2:])               # (Cin,B,Hp,m2)
    # forward DFT along h over the kept rows (complex, tiny)
    t2 = jnp.einsum('cbhl,hj->cbjl', t1c, fh)                   # (Cin,B,2m1,m2)
    # per-mode complex channel mixing == torch.einsum('bixy,ioxy->boxy')
    o = jnp.einsum('cbjl,cojl->objl', t2, w_c)                  # (Cout,B,2m1,m2)
    # inverse DFT along h (complex, tiny)
    y = jnp.einsum('objl,jh->obhl', o, gh)                      # (Cout,B,Hp,m2)
    # inverse real DFT along w; emit bf16 directly for the fused block kernel
    ystk = jnp.concatenate([jnp.real(y), -jnp.imag(y)],
                           axis=-1).astype(_ACT_DTYPE)          # (Cout,B,Hp,2m2)
    x1 = jnp.einsum('obhl,lw->obhw', ystk, gw)                  # (Cout,B,Hp,Wp) bf16
    return x1.reshape(cout, b * hp * wp)


# ------------------------------ model pieces -------------------------------

def _xavier_uniform(key, fan_in, fan_out, shape):
    a = math.sqrt(6.0 / (fan_in + fan_out))
    return jax.random.uniform(key, shape, jnp.float32, -a, a)


def init_params(key, width, modes1, modes2, in_ch=3, fc1_dim=128, out_ch=4):
    keys = jax.random.split(key, 12)
    scale = 1.0 / (width * width)
    params = {}
    # Linear / Conv2d(1x1) weights stored torch-style as (out, in).
    params["fc0_w"] = _xavier_uniform(keys[0], in_ch, width, (width, in_ch))
    params["fc0_b"] = jnp.zeros((width,), jnp.float32)
    for i in range(4):
        kr1, ki1, kr2, ki2, kw = jax.random.split(keys[1 + i], 5)
        shp = (width, width, modes1, modes2)
        params[f"conv{i}_w1"] = (scale * (jax.random.normal(kr1, shp)
                                          + 1j * jax.random.normal(ki1, shp))
                                 ).astype(jnp.complex64)
        params[f"conv{i}_w2"] = (scale * (jax.random.normal(kr2, shp)
                                          + 1j * jax.random.normal(ki2, shp))
                                 ).astype(jnp.complex64)
        params[f"w{i}_w"] = _xavier_uniform(kw, width, width, (width, width))
        params[f"w{i}_b"] = jnp.zeros((width,), jnp.float32)
    params["fc1_w"] = _xavier_uniform(keys[10], width, fc1_dim, (fc1_dim, width))
    params["fc1_b"] = jnp.zeros((fc1_dim,), jnp.float32)
    params["fc2_w"] = _xavier_uniform(keys[11], fc1_dim, out_ch, (out_ch, fc1_dim))
    params["fc2_b"] = jnp.zeros((out_ch,), jnp.float32)
    return params


def prepare_params(params):
    """Fold the eval-mode BatchNorm scale, cast matmul weights to bf16 and
    stack the two spectral weight banks along the row-mode axis."""
    s = 1.0 / math.sqrt(1.0 + _BN_EPS)   # fresh running stats, gamma=1, beta=0
    cin0 = params["fc0_w"].shape[1]
    cin0_pad = _round_up(cin0, 8)
    prm = {
        "fc0_w": jnp.pad(params["fc0_w"],
                         ((0, 0), (0, cin0_pad - cin0))).astype(_ACT_DTYPE),
        "fc0_b": params["fc0_b"].reshape(-1, 1),
        "fc1_w": params["fc1_w"].astype(_ACT_DTYPE),
        "fc1_b": params["fc1_b"].reshape(-1, 1),
        "fc2_w": params["fc2_w"].astype(_ACT_DTYPE),
        "fc2_b": params["fc2_b"].reshape(-1, 1),
    }
    for i in range(4):
        prm[f"w{i}_w"] = (params[f"w{i}_w"] * s).astype(_ACT_DTYPE)
        prm[f"w{i}_b"] = (params[f"w{i}_b"] * s).reshape(-1, 1)
        prm[f"spec{i}_w"] = (jnp.concatenate([params[f"conv{i}_w1"],
                                              params[f"conv{i}_w2"]], axis=2)
                             * s).astype(jnp.complex64)        # (Ci,Co,2m1,m2)
    return prm


def fno2d_forward(params, x, t, *, H, W, modes1, modes2, width):
    B = x.shape[0]
    Hp, Wp = H + 2, W + 2
    assert 2 * modes1 <= Hp and modes2 <= Wp // 2 + 1, "modes too large for grid"
    prm = prepare_params(params)
    dft = _make_dft_mats(Hp, Wp, modes1, modes2)

    # ---- inputs, channels-first flattened (C, B*H*W), pixels on lanes, bf16 ----
    cin0 = prm["fc0_w"].shape[1]
    x2 = x.reshape(B, 2, H, W).transpose(1, 0, 2, 3).astype(_ACT_DTYPE)
    tmap = jnp.broadcast_to(t.reshape(1, B, 1, 1).astype(_ACT_DTYPE),
                            (1, B, H, W))
    chans = [x2, tmap]
    if cin0 > 3:
        chans.append(jnp.zeros((cin0 - 3, B, H, W), _ACT_DTYPE))
    inp = jnp.concatenate(chans, axis=0).reshape(cin0, B * H * W)

    # ---- fc0 (pointwise linear over channels) ----
    h0 = pointwise_linear(inp, prm["fc0_w"], prm["fc0_b"])
    h0 = h0.reshape(width, B, H, W)

    # ---- ReplicationPad2d(1) ----
    P = B * Hp * Wp
    slab = jnp.pad(h0, ((0, 0), (0, 0), (1, 1), (1, 1)),
                   mode="edge").reshape(width, P)              # (width, P) bf16

    # ---- 4 FNO blocks: spectral(x) + Conv1x1(x) -> BN scale (folded) -> gelu ----
    for i in range(4):
        x1 = spectral_conv_dft(slab, prm[f"spec{i}_w"], dft,
                               b=B, hp=Hp, wp=Wp, m1=modes1, m2=modes2)
        slab = pointwise_linear(slab, prm[f"w{i}_w"], prm[f"w{i}_b"],
                                res2d=x1, apply_gelu=True)
        # Dropout(0.1) is identity in eval mode.

    # ---- fused fc1 -> gelu -> fc2 head ----
    out = head_fused(slab, prm["fc1_w"], prm["fc1_b"],
                     prm["fc2_w"], prm["fc2_b"])
    out = out.reshape(4, B, Hp, Wp)
    u = out[0].reshape(B, -1)
    v = out[1].reshape(B, -1)
    p_field = out[2].reshape(B, -1)
    T_field = out[3].reshape(B, -1)
    return u, v, p_field, T_field


if __name__ == "__main__":
    B, H, W = 2, 6, 10
    modes1 = modes2 = 3
    width = 16

    key = jax.random.PRNGKey(0)
    kp, kx, kt = jax.random.split(key, 3)
    params = init_params(kp, width, modes1, modes2)
    x = jax.random.normal(kx, (B, 2 * H * W), jnp.float32)
    t = jax.random.normal(kt, (B,), jnp.float32)

    fwd = jax.jit(partial(fno2d_forward, H=H, W=W, modes1=modes1,
                          modes2=modes2, width=width))
    u, v, p_out, T_out = fwd(params, x, t)
    jax.block_until_ready((u, v, p_out, T_out))

    assert u.shape == (B, (H + 2) * (W + 2)) and T_out.shape == u.shape
    bad = False
    for a in (u, v, p_out, T_out):
        bad = bad or bool(jnp.isnan(a).any() | jnp.isinf(a).any())
    if bad:
        raise ValueError("NaN or Inf values detected in network output")
    print("KERNEL_OK")
</pallas_src>

<mosaic_0001>
module attributes {stable_mosaic.version = 11 : i64} {
  func.func @kernel(%arg0: i32, %arg1: memref<8x120xbf16, #tpu.memory_space<vmem>>, %arg2: memref<16x8xbf16, #tpu.memory_space<vmem>>, %arg3: memref<16x1xf32, #tpu.memory_space<vmem>>, %arg4: memref<16x120xbf16, #tpu.memory_space<vmem>>) attributes {dimension_semantics = [#tpu.dimension_semantics<parallel>], iteration_bounds = array<i64: 1>, scalar_prefetch = 0 : i64, scratch_operands = 0 : i64, tpu.core_type = #tpu.core_type<tc>, window_params = [{transform_indices = @transform_0, window_bounds = array<i64: 8, 120>}, {pipeline_mode = #tpu.pipeline_mode<synchronous>, transform_indices = @transform_1, window_bounds = array<i64: 16, 8>}, {pipeline_mode = #tpu.pipeline_mode<synchronous>, transform_indices = @transform_2, window_bounds = array<i64: 16, 1>}, {transform_indices = @transform_3, window_bounds = array<i64: 16, 120>}]} {
    %c0 = arith.constant 0 : index
    %c0_0 = arith.constant 0 : index
    %0 = vector.load %arg2[%c0, %c0_0] : memref<16x8xbf16, #tpu.memory_space<vmem>>, vector<16x8xbf16>
    %c0_1 = arith.constant 0 : index
    %c0_2 = arith.constant 0 : index
    %1 = vector.load %arg1[%c0_1, %c0_2] : memref<8x120xbf16, #tpu.memory_space<vmem>>, vector<8x120xbf16>
    %cst = arith.constant dense<0.000000e+00> : vector<16x120xf32>
    %2 = tpu.matmul %0, %1, %cst {dimension_numbers = #tpu.dot_dimension_numbers<[1], [0], [0], [1], [0, 0, 1, 1], [], []>} : vector<16x8xbf16>, vector<8x120xbf16>, vector<16x120xf32> -> vector<16x120xf32>
    %c0_3 = arith.constant 0 : index
    %c0_4 = arith.constant 0 : index
    %3 = vector.load %arg3[%c0_3, %c0_4] : memref<16x1xf32, #tpu.memory_space<vmem>>, vector<16x1xf32>
    %4 = vector.broadcast %3 : vector<16x1xf32> to vector<16x120xf32>
    %5 = arith.addf %2, %4 : vector<16x120xf32>
    %6 = arith.truncf %5 : vector<16x120xf32> to vector<16x120xbf16>
    %c0_5 = arith.constant 0 : index
    %c0_6 = arith.constant 0 : index
    %7 = vector.load %arg4[%c0_5, %c0_6] : memref<16x120xbf16, #tpu.memory_space<vmem>>, vector<16x120xbf16>
    tpu.vector_store %arg4[%c0_5, %c0_6], %6 {strides = array<i32>} : memref<16x120xbf16, #tpu.memory_space<vmem>>, vector<16x120xbf16>,
    return
  }
  func.func @transform_0(%arg0: i32) -> (i32, i32) {
    %c0_i32 = arith.constant 0 : i32
    %c0_i32_0 = arith.constant 0 : i32
    return %c0_i32, %arg0 : i32, i32
  }
  func.func @transform_1(%arg0: i32) -> (i32, i32) {
    %c0_i32 = arith.constant 0 : i32
    %c0_i32_0 = arith.constant 0 : i32
    %c0_i32_1 = arith.constant 0 : i32
    return %c0_i32, %c0_i32_0 : i32, i32
  }
  func.func @transform_2(%arg0: i32) -> (i32, i32) {
    %c0_i32 = arith.constant 0 : i32
    %c0_i32_0 = arith.constant 0 : i32
    %c0_i32_1 = arith.constant 0 : i32
    return %c0_i32, %c0_i32_0 : i32, i32
  }
  func.func @transform_3(%arg0: i32) -> (i32, i32) {
    %c0_i32 = arith.constant 0 : i32
    %c0_i32_0 = arith.constant 0 : i32
    return %c0_i32, %arg0 : i32, i32
  }
}

module attributes {stable_mosaic.version = 11 : i64} {
  func.func @kernel(%arg0: i32, %arg1: memref<16x128xbf16, #tpu.memory_space<vmem>>, %arg2: memref<16x128xbf16, #tpu.memory_space<vmem>>, %arg3: memref<16x16xbf16, #tpu.memory_space<vmem>>, %arg4: memref<16x1xf32, #tpu.memory_space<vmem>>, %arg5: memref<16x128xbf16, #tpu.memory_space<vmem>>) attributes {dimension_semantics = [#tpu.dimension_semantics<parallel>], iteration_bounds = array<i64: 2>, scalar_prefetch = 0 : i64, scratch_operands = 0 : i64, tpu.core_type = #tpu.core_type<tc>, window_params = [{transform_indices = @transform_0, window_bounds = array<i64: 16, 128>}, {transform_indices = @transform_1, window_bounds = array<i64: 16, 128>}, {pipeline_mode = #tpu.pipeline_mode<synchronous>, transform_indices = @transform_2, window_bounds = array<i64: 16, 16>}, {pipeline_mode = #tpu.pipeline_mode<synchronous>, transform_indices = @transform_3, window_bounds = array<i64: 16, 1>}, {transform_indices = @transform_4, window_bounds = array<i64: 16, 128>}]} {
    %c0 = arith.constant 0 : index
    %c0_0 = arith.constant 0 : index
    %0 = vector.load %arg3[%c0, %c0_0] : memref<16x16xbf16, #tpu.memory_space<vmem>>, vector<16x16xbf16>
    %c0_1 = arith.constant 0 : index
    %c0_2 = arith.constant 0 : index
    %1 = vector.load %arg1[%c0_1, %c0_2] : memref<16x128xbf16, #tpu.memory_space<vmem>>, vector<16x128xbf16>
    %cst = arith.constant dense<0.000000e+00> : vector<16x128xf32>
    %2 = tpu.matmul %0, %1, %cst {dimension_numbers = #tpu.dot_dimension_numbers<[1], [0], [0], [1], [0, 0, 1, 1], [], []>} : vector<16x16xbf16>, vector<16x128xbf16>, vector<16x128xf32> -> vector<16x128xf32>
    %c0_3 = arith.constant 0 : index
    %c0_4 = arith.constant 0 : index
    %3 = vector.load %arg4[%c0_3, %c0_4] : memref<16x1xf32, #tpu.memory_space<vmem>>, vector<16x1xf32>
    %4 = vector.broadcast %3 : vector<16x1xf32> to vector<16x128xf32>
    %5 = arith.addf %2, %4 : vector<16x128xf32>
    %c0_5 = arith.constant 0 : index
    %c0_6 = arith.constant 0 : index
    %6 = vector.load %arg2[%c0_5, %c0_6] : memref<16x128xbf16, #tpu.memory_space<vmem>>, vector<16x128xbf16>
    %7 = arith.extf %6 : vector<16x128xbf16> to vector<16x128xf32>
    %8 = arith.addf %5, %7 : vector<16x128xf32>
    %cst_7 = arith.constant 5.000000e-01 : f32
    %9 = vector.broadcast %cst_7 : f32 to vector<16x128xf32>
    %10 = arith.mulf %9, %8 : vector<16x128xf32>
    %cst_8 = arith.constant 0.707106769 : f32
    %11 = vector.broadcast %cst_8 : f32 to vector<16x128xf32>
    %12 = arith.mulf %8, %11 : vector<16x128xf32>
    %13 = math.erf %12 : vector<16x128xf32>
    %cst_9 = arith.constant 1.000000e+00 : f32
    %14 = vector.broadcast %cst_9 : f32 to vector<16x128xf32>
    %15 = arith.addf %14, %13 : vector<16x128xf32>
    %16 = arith.mulf %10, %15 : vector<16x128xf32>
    %17 = arith.truncf %16 : vector<16x128xf32> to vector<16x128xbf16>
    %c0_10 = arith.constant 0 : index
    %c0_11 = arith.constant 0 : index
    %18 = vector.load %arg5[%c0_10, %c0_11] : memref<16x128xbf16, #tpu.memory_space<vmem>>, vector<16x128xbf16>
    tpu.vector_store %arg5[%c0_10, %c0_11], %17 {strides = array<i32>} : memref<16x128xbf16, #tpu.memory_space<vmem>>, vector<16x128xbf16>,
    return
  }
  func.func @transform_0(%arg0: i32) -> (i32, i32) {
    %c0_i32 = arith.constant 0 : i32
    %c0_i32_0 = arith.constant 0 : i32
    return %c0_i32, %arg0 : i32, i32
  }
  func.func @transform_1(%arg0: i32) -> (i32, i32) {
    %c0_i32 = arith.constant 0 : i32
    %c0_i32_0 = arith.constant 0 : i32
    return %c0_i32, %arg0 : i32, i32
  }
  func.func @transform_2(%arg0: i32) -> (i32, i32) {
    %c0_i32 = arith.constant 0 : i32
    %c0_i32_0 = arith.constant 0 : i32
    %c0_i32_1 = arith.constant 0 : i32
    return %c0_i32, %c0_i32_0 : i32, i32
  }
  func.func @transform_3(%arg0: i32) -> (i32, i32) {
    %c0_i32 = arith.constant 0 : i32
    %c0_i32_0 = arith.constant 0 : i32
    %c0_i32_1 = arith.constant 0 : i32
    return %c0_i32, %c0_i32_0 : i32, i32
  }
  func.func @transform_4(%arg0: i32) -> (i32, i32) {
    %c0_i32 = arith.constant 0 : i32
    %c0_i32_0 = arith.constant 0 : i32
    return %c0_i32, %arg0 : i32, i32
  }
}

module attributes {stable_mosaic.version = 11 : i64} {
  func.func @_head_kernel(%arg0: i32, %arg1: memref<16x128xbf16, #tpu.memory_space<vmem>>, %arg2: memref<128x16xbf16, #tpu.memory_space<vmem>>, %arg3: memref<128x1xf32, #tpu.memory_space<vmem>>, %arg4: memref<4x128xbf16, #tpu.memory_space<vmem>>, %arg5: memref<4x1xf32, #tpu.memory_space<vmem>>, %arg6: memref<4x128xf32, #tpu.memory_space<vmem>>) attributes {dimension_semantics = [#tpu.dimension_semantics<parallel>], iteration_bounds = array<i64: 2>, scalar_prefetch = 0 : i64, scratch_operands = 0 : i64, tpu.core_type = #tpu.core_type<tc>, window_params = [{transform_indices = @transform_0, window_bounds = array<i64: 16, 128>}, {pipeline_mode = #tpu.pipeline_mode<synchronous>, transform_indices = @transform_1, window_bounds = array<i64: 128, 16>}, {pipeline_mode = #tpu.pipeline_mode<synchronous>, transform_indices = @transform_2, window_bounds = array<i64: 128, 1>}, {pipeline_mode = #tpu.pipeline_mode<synchronous>, transform_indices = @transform_3, window_bounds = array<i64: 4, 128>}, {pipeline_mode = #tpu.pipeline_mode<synchronous>, transform_indices = @transform_4, window_bounds = array<i64: 4, 1>}, {transform_indices = @transform_5, window_bounds = array<i64: 4, 128>}]} {
    %c0 = arith.constant 0 : index
    %c0_0 = arith.constant 0 : index
    %0 = vector.load %arg2[%c0, %c0_0] : memref<128x16xbf16, #tpu.memory_space<vmem>>, vector<128x16xbf16>
    %c0_1 = arith.constant 0 : index
    %c0_2 = arith.constant 0 : index
    %1 = vector.load %arg1[%c0_1, %c0_2] : memref<16x128xbf16, #tpu.memory_space<vmem>>, vector<16x128xbf16>
    %cst = arith.constant dense<0.000000e+00> : vector<128x128xf32>
    %2 = tpu.matmul %0, %1, %cst {dimension_numbers = #tpu.dot_dimension_numbers<[1], [0], [0], [1], [0, 0, 1, 1], [], []>} : vector<128x16xbf16>, vector<16x128xbf16>, vector<128x128xf32> -> vector<128x128xf32>
    %c0_3 = arith.constant 0 : index
    %c0_4 = arith.constant 0 : index
    %3 = vector.load %arg3[%c0_3, %c0_4] : memref<128x1xf32, #tpu.memory_space<vmem>>, vector<128x1xf32>
    %4 = vector.broadcast %3 : vector<128x1xf32> to vector<128x128xf32>
    %5 = arith.addf %2, %4 : vector<128x128xf32>
    %cst_5 = arith.constant 5.000000e-01 : f32
    %6 = vector.broadcast %cst_5 : f32 to vector<128x128xf32>
    %7 = arith.mulf %6, %5 : vector<128x128xf32>
    %cst_6 = arith.constant 0.707106769 : f32
    %8 = vector.broadcast %cst_6 : f32 to vector<128x128xf32>
    %9 = arith.mulf %5, %8 : vector<128x128xf32>
    %10 = math.erf %9 : vector<128x128xf32>
    %cst_7 = arith.constant 1.000000e+00 : f32
    %11 = vector.broadcast %cst_7 : f32 to vector<128x128xf32>
    %12 = arith.addf %11, %10 : vector<128x128xf32>
    %13 = arith.mulf %7, %12 : vector<128x128xf32>
    %c0_8 = arith.constant 0 : index
    %c0_9 = arith.constant 0 : index
    %14 = vector.load %arg4[%c0_8, %c0_9] : memref<4x128xbf16, #tpu.memory_space<vmem>>, vector<4x128xbf16>
    %15 = arith.truncf %13 : vector<128x128xf32> to vector<128x128xbf16>
    %cst_10 = arith.constant dense<0.000000e+00> : vector<4x128xf32>
    %16 = tpu.matmul %14, %15, %cst_10 {dimension_numbers = #tpu.dot_dimension_numbers<[1], [0], [0], [1], [0, 0, 1, 1], [], []>} : vector<4x128xbf16>, vector<128x128xbf16>, vector<4x128xf32> -> vector<4x128xf32>
    %c0_11 = arith.constant 0 : index
    %c0_12 = arith.constant 0 : index
    %17 = vector.load %arg5[%c0_11, %c0_12] : memref<4x1xf32, #tpu.memory_space<vmem>>, vector<4x1xf32>
    %18 = vector.broadcast %17 : vector<4x1xf32> to vector<4x128xf32>
    %19 = arith.addf %16, %18 : vector<4x128xf32>
    %c0_13 = arith.constant 0 : index
    %c0_14 = arith.constant 0 : index
    %20 = vector.load %arg6[%c0_13, %c0_14] : memref<4x128xf32, #tpu.memory_space<vmem>>, vector<4x128xf32>
    tpu.vector_store %arg6[%c0_13, %c0_14], %19 {strides = array<i32>} : memref<4x128xf32, #tpu.memory_space<vmem>>, vector<4x128xf32>,
    return
  }
  func.func @transform_0(%arg0: i32) -> (i32, i32) {
    %c0_i32 = arith.constant 0 : i32
    %c0_i32_0 = arith.constant 0 : i32
    return %c0_i32, %arg0 : i32, i32
  }
  func.func @transform_1(%arg0: i32) -> (i32, i32) {
    %c0_i32 = arith.constant 0 : i32
    %c0_i32_0 = arith.constant 0 : i32
    %c0_i32_1 = arith.constant 0 : i32
    return %c0_i32, %c0_i32_0 : i32, i32
  }
  func.func @transform_2(%arg0: i32) -> (i32, i32) {
    %c0_i32 = arith.constant 0 : i32
    %c0_i32_0 = arith.constant 0 : i32
    %c0_i32_1 = arith.constant 0 : i32
    return %c0_i32, %c0_i32_0 : i32, i32
  }
  func.func @transform_3(%arg0: i32) -> (i32, i32) {
    %c0_i32 = arith.constant 0 : i32
    %c0_i32_0 = arith.constant 0 : i32
    %c0_i32_1 = arith.constant 0 : i32
    return %c0_i32, %c0_i32_0 : i32, i32
  }
  func.func @transform_4(%arg0: i32) -> (i32, i32) {
    %c0_i32 = arith.constant 0 : i32
    %c0_i32_0 = arith.constant 0 : i32
    %c0_i32_1 = arith.constant 0 : i32
    return %c0_i32, %c0_i32_0 : i32, i32
  }
  func.func @transform_5(%arg0: i32) -> (i32, i32) {
    %c0_i32 = arith.constant 0 : i32
    %c0_i32_0 = arith.constant 0 : i32
    return %c0_i32, %arg0 : i32, i32
  }
}

</mosaic_0001>

<bundles_post_ra>
// kernel: custom-call.3
= control target key start
LH: loop header
LB: loop body
LE: loop exit
PB: predicated region body
PF: predicated region fallthrough
CT: control target
= control target key end

     0   :  { %s59_s0 = inlined_call_operand.hbm [shape: c64[16,16,3,3], index: 0, kind: input, shape index: {}]   ;;  %s60_s1 = inlined_call_operand.vmem [shape: f32[16,16,3,3], index: 1, kind: output, shape index: {}]  }
   0x1   :  { %s2_s8 = scalar_lea.hbm %s59_s0, 2304 }
   0x2   :  { %3 = vsyncpa [#allocation0], 0  ;;  %s4_s11 = sshll.u32 %s60_s1, 4  ;;  %s34_s14 = scalar_lea.hbm %s59_s0, 4608  ;;  %s5_s11 = int_to_ptr.vmem [resolvable:$true] %s4_s11 }
   0x3   :  { %p11_p0 = scmp.ne.s32.totalorder %s2_s8, %s34_s14  ;;  %p13_p1 = scmp.lt.u32.totalorder %s2_s8, %s59_s0 }
   0x4   :  { %p14_p2 = scmp.lt.u32.totalorder %s34_s14, %s34_s14  ;;  %p16_p4 = scmp.lt.u32.totalorder %s34_s14, %s2_s8 }
   0x6   :  { %p15_p3 = por %p14_p2, %p13_p1 }
   0x8   :  { %p17_p5 = por %p16_p4, %p15_p3 }
   0xa   :  { %p18_p6 = pnand %p17_p5, %p11_p0 }
   0xc   :  { %21 = shalt.err (!%p18_p6)  }
   0xd   :  { %s22_s17 = scalar_lea.vmem %s5_s11, 2304  ;;  %p27_p8 = scmp.lt.s32.totalorder %s5_s11, %s5_s11 }
   0xe   :  { %p23_p7 = scmp.ne.s32.totalorder %s5_s11, %s22_s17  ;;  %p28_p9 = scmp.lt.s32.totalorder %s22_s17, %s22_s17 }
  0x10   :  { %p29_p10 = por %p28_p9, %p27_p8 }
  0x12   :  { %p30_p11 = pnand %p29_p10, %p23_p7 }
  0x14   :  { %33 = shalt.err (!%p30_p11)  }
  0x15   :  { %7 = dma.hbm_to_vmem [thread:$0]  %s2_s8, 2304, %s5_s11, [#allocation0] }
  0x16   :  { %35 = dma.done.wait [#allocation0], 2304  }
  0x17   :  { %36 = vsyncadd [#allocation0], 4294964992 }
  0x18   :  { %9 = vsyncpa [#allocation0], 1 }

// kernel: custom-call.2
= control target key start
LH: loop header
LB: loop body
LE: loop exit
PB: predicated region body
PF: predicated region fallthrough
CT: control target
= control target key end

     0   :  { %2 = vsyncpa [#allocation0], 0  ;;  %s61_s0 = inlined_call_operand.hbm [shape: c64[16,16,3,3], index: 0, kind: input, shape index: {}]   ;;  %s62_s1 = inlined_call_operand.vmem [shape: f32[16,16,3,3], index: 1, kind: output, shape index: {}]  }
   0x1   :  { %s3_s8 = sshll.u32 %s62_s1, 4  ;;  %s9_s11 = scalar_lea.hbm %s61_s0, 2304  ;;  %s4_s8 = int_to_ptr.vmem [resolvable:$true] %s3_s8 }
   0x2   :  { %p10_p0 = scmp.ne.s32.totalorder %s61_s0, %s9_s11  ;;  %s11_s16 = scalar_lea.hbm %s61_s0, 4608 }
   0x3   :  { %p12_p1 = scmp.lt.u32.totalorder %s11_s16, %s9_s11  ;;  %p13_p2 = scmp.lt.u32.totalorder %s9_s11, %s61_s0 }
   0x5   :  { %p14_p3 = por %p13_p2, %p12_p1 }
   0x7   :  { %p15_p4 = pnand %p14_p3, %p10_p0 }
   0x9   :  { %18 = shalt.err (!%p15_p4)  }
   0xa   :  { %s19_s1 = scalar_lea.vmem %s4_s8, 2304  ;;  %p24_p6 = scmp.lt.s32.totalorder %s4_s8, %s4_s8 }
   0xb   :  { %p20_p5 = scmp.ne.s32.totalorder %s4_s8, %s19_s1  ;;  %p25_p7 = scmp.lt.s32.totalorder %s19_s1, %s19_s1 }
   0xd   :  { %p26_p8 = por %p25_p7, %p24_p6 }
   0xf   :  { %p27_p9 = pnand %p26_p8, %p20_p5 }
  0x11   :  { %30 = shalt.err (!%p27_p9)  }
  0x12   :  { %6 = dma.hbm_to_vmem [thread:$0]  %s61_s0, 2304, %s4_s8, [#allocation0] }
  0x13   :  { %31 = dma.done.wait [#allocation0], 2304  }
  0x14   :  { %32 = vsyncadd [#allocation0], 4294964992 }
  0x15   :  { %8 = vsyncpa [#allocation0], 1 }

// kernel: fno2d_forward.6
= control target key start
LH: loop header
LB: loop body
LE: loop exit
PB: predicated region body
PF: predicated region fallthrough
CT: control target
= control target key end

     0   :  { %8 = vsyncpa [#allocation3], 0  ;;  %s359_s0 = inlined_call_operand.hbm [shape: bf16[8,120], index: 0, kind: input, shape index: {}]   ;;  %s360_s1 = inlined_call_operand.hbm [shape: bf16[16,8], index: 1, kind: input, shape index: {}]   ;;  %s361_s2 = inlined_call_operand.hbm [shape: f32[16,1], index: 2, kind: input, shape index: {}]   ;;  %s362_s3 = inlined_call_operand.hbm [shape: bf16[16,120], index: 3, kind: output, shape index: {}]  }
   0x1   :  { %9 = vsyncpa [#allocation6], 0 }
   0x2   :  { %10 = vsyncpa [#allocation4], 0  ;;  %s274_s12 = smov [#allocation5]   ;;  %s180_s16 = scalar_lea.hbm %s360_s1, 128 }
   0x3   :  { %s26_s13 = sshll.u32 %s274_s12, 4  ;;  %p181_p0 = scmp.ne.s32.totalorder %s360_s1, %s180_s16  ;;  %s27_s13 = int_to_ptr.vmem [resolvable:$true] %s26_s13 }
   0x4   :  { %p184_p1 = scmp.lt.u32.totalorder %s180_s16, %s360_s1 }
   0x6   :  { %p186_p2 = pnand %p184_p1, %p181_p0 }
   0x8   :  { %189 = shalt.err (!%p186_p2)
}
   0x9   :  { %s190_s21 = scalar_lea.vmem %s27_s13, 128  ;;  %p195_p4 = scmp.lt.s32.totalorder %s27_s13, %s27_s13 }
   0xa   :  { %p191_p3 = scmp.ne.s32.totalorder %s27_s13, %s190_s21  ;;  %p196_p5 = scmp.lt.s32.totalorder %s190_s21, %s190_s21 }
   0xc   :  { %p197_p6 = por %p196_p5, %p195_p4 }
   0xe   :  { %p198_p7 = pnand %p197_p6, %p191_p3 }
  0x10   :  { %201 = shalt.err (!%p198_p7)
}
  0x11   :  { %s275_s22 = smov 64   ;;  %s276_s23 = smov 4  }
  0x12   :  { %32 = dma.hbm_to_vmem [thread:$0]  %s360_s1, 128, %s27_s13, [#allocation6], %s275_s22, %s275_s22, %s276_s23  }
  0x13   :  { %s277_s26 = smov [#allocation2]   ;;  %s278_s28 = smov [#allocation7]  }
  0x14   :  { %s17_s27 = sshll.u32 %s277_s26, 4  ;;  %s38_s29 = sshll.u32 %s278_s28, 4  ;;  %s18_s27 = int_to_ptr.vmem [resolvable:$true] %s17_s27  ;;  %s39_s29 = int_to_ptr.vmem [resolvable:$true] %s38_s29 }
  0x15   :  { %s202_s5 = scalar_lea.hbm %s359_s0, 64 }
  0x16   :  { %p203_p8 = scmp.ne.s32.totalorder %s359_s0, %s202_s5  ;;  %p206_p9 = scmp.lt.u32.totalorder %s202_s5, %s359_s0 }
  0x18   :  { %p208_p10 = pnand %p206_p9, %p203_p8 }
  0x1a   :  { %211 = shalt.err (!%p208_p10)
}
  0x1b   :  { %s212_s1 = scalar_lea.vmem %s18_s27, 64  ;;  %p217_p12 = scmp.lt.s32.totalorder %s18_s27, %s18_s27 }
  0x1c   :  { %p213_p11 = scmp.ne.s32.totalorder %s18_s27, %s212_s1  ;;  %p218_p13 = scmp.lt.s32.totalorder %s212_s1, %s212_s1 }
  0x1e   :  { %p219_p0 = por %p218_p13, %p217_p12 }
  0x20   :  { %p220_p1 = pnand %p219_p0, %p213_p11 }
  0x22   :  { %223 = shalt.err (!%p220_p1)
}
  0x23   :  { %20 = dma.hbm_to_vmem [thread:$0]  %s359_s0, 64, %s18_s27, [#allocation3]  }
  0x24   :  { %s224_s14 = scalar_lea.hbm %s361_s2, 256 }
  0x25   :  { %p225_p2 = scmp.ne.s32.totalorder %s361_s2, %s224_s14  ;;  %p228_p3 = scmp.lt.u32.totalorder %s224_s14, %s361_s2 }
  0x27   :  { %p230_p4 = pnand %p228_p3, %p225_p2 }
  0x29   :  { %233 = shalt.err (!%p230_p4)
}
  0x2a   :  { %s234_s19 = scalar_lea.vmem %s39_s29, 256  ;;  %p239_p6 = scmp.lt.s32.totalorder %s39_s29, %s39_s29 }
  0x2b   :  { %p235_p5 = scmp.ne.s32.totalorder %s39_s29, %s234_s19  ;;  %p240_p7 = scmp.lt.s32.totalorder %s234_s19, %s234_s19 }
  0x2d   :  { %p241_p8 = por %p240_p7, %p239_p6 }
  0x2f   :  { %p242_p9 = pnand %p241_p8, %p235_p5 }
  0x31   :  { %245 = shalt.err (!%p242_p9)
}
  0x32   :  { %s279_s0 = smov 128   ;;  %s280_s20 = smov 8  }
  0x33   :  { %44 = dma.hbm_to_vmem [thread:$0]  %s361_s2, 256, %s39_s29, [#allocation6], %s279_s0, %s279_s0, %s280_s20  }
  0x34   :  { %268 = dma.done.wait [#allocation3], 64  }
  0x35   :  { %269 = vsyncadd [#allocation3], 4294967232 }
  0x36   :  { %270 = dma.done.wait [#allocation6], 384  }
  0x37   :  { %271 = vsyncadd [#allocation6], 4294966912  ;;  %v281_v0 = vmov 0.0   ;;  %vm282_vm0 = vmmov 0   ;;  %v283_v1 = vmov 0   ;;  %vm79_vm1 = vcmask 1043456  }
  0x38   :  { %161 = vmatprep.subr.bf16.mxu0 %v281_v0  ;;  %163 = vmatprep.mubr.msk.bf16.mxu0 %vm282_vm0, %v281_v0  ;;  %v57_v2 = vld [vmem:[#allocation2] sm:$0xf]  ;;  %v179_v4 = vld [vmem:[#allocation5] sm:$0xff]   ;;  %v58_v5 = vld [vmem:[#allocation7] sm:$0xff]  ;;  %vm75_vm2 = vcmask 64512   ;;  %vm132_vm3 = vcmask 977920  }
  0x39   :  { %178 = vset.pattern.permute.xlu0 %v283_v1  ;;  %v81_v3 = vsel %vm79_vm1, %v57_v2, 0  ;;  %v59_v6 = vld [vmem:[#allocation7 + $0x8] sm:$0xff]  ;;  %s284_s2 = smov [#allocation8]  }
  0x3a   :  { %162 = vmatpush3.bf16.msra.mxu0 %v81_v3  ;;  %62 = vperm.xlu0 %178, %v58_v5   ;;  %s140_s25 = sshll.u32 %s284_s2, 4  ;;  %s141_s25 = int_to_ptr.vmem [resolvable:$true] %s140_s25 }
  0x3b   :  { %s246_s26 = scalar_lea.vmem %s141_s25, 128  ;;  %p251_p11 = scmp.lt.s32.totalorder %s141_s25, %s141_s25 }
  0x3c   :  { %p247_p10 = scmp.ne.s32.totalorder %s141_s25, %s246_s26  ;;  %p252_p12 = scmp.lt.s32.totalorder %s246_s26, %s246_s26 }
  0x3d   :  { %164 = vmatmul.mubr.msk.bf16.vlgmr.msra.gmra.mrb[0].mxu0 %vm75_vm2, %v179_v4 }
  0x3e   :  { %67 = vperm.xlu0 %178, %v59_v6   ;;  %p253_p13 = por %p252_p12, %p251_p11 }
  0x40   :  { %p254_p0 = pnand %p253_p13, %p247_p10 }
  0xb9   :  { %v63_v7 = vpop.permute.xlu0 %62 }
  0xbd   :  { %v68_v11 = vpop.permute.xlu0 %67 }
 0x110   :  { %v117_v8 = vpop.f32.mrb[0].mxu0 }
 0x111   :  { %v118_v9 = vadd.f32 %v117_v8, %v63_v7  ;;  %v165_v10 = vpop.f32.mrb[1].mxu0 }
 0x112   :  { %v120_v12 = vpop.f32.mrb[2].mxu0 }
 0x113   :  { %v157_v13 = vpack.c.bf16 %v118_v9, %v118_v9  ;;  %v121_v14 = vadd.f32 %v120_v12, %v68_v11  ;;  %v166_v15 = vpop.f32.mrb[3].mxu0 }
 0x115   :  { %v158_v16 = vpack.c.bf16 %v121_v14, %v121_v14  ;;  %133 = vst.msk [vmem:[#allocation8] sm:$0xf] %vm132_vm3, %v157_v13 }
 0x117   :  { %134 = vst.msk [vmem:[#allocation8 + $0x4] sm:$0xf] %vm132_vm3, %v158_v16 }
 0x118   :  { %257 = shalt.err (!%p254_p0)
}
 0x119   :  { %s258_s29 = scalar_lea.hbm %s362_s3, 128 }
 0x11a   :  { %p259_p1 = scmp.ne.s32.totalorder %s362_s3, %s258_s29  ;;  %p262_p2 = scmp.lt.u32.totalorder %s258_s29, %s362_s3 }
 0x11c   :  { %p264_p3 = pnand %p262_p2, %p259_p1 }
 0x11e   :  { %267 = shalt.err (!%p264_p3)
}
 0x11f   :  { %146 = dma.vmem_to_hbm [thread:$0]  %s141_s25, 128, %s362_s3, [#allocation4], %s275_s22, %s275_s22, %s276_s23  }
 0x120   :  { %272 = dma.done.wait [#allocation4], 128  }
 0x121   :  { %273 = vsyncadd [#allocation4], 4294967168 }
 0x122   :  { %150 = vsyncpa [#allocation3], 1 }
 0x123   :  { %151 = vsyncpa [#allocation6], 1 }
 0x124   :  { %152 = vsyncpa [#allocation4], 1 }

// kernel: squeeze.4
= control target key start
LH: loop header
LB: loop body
LE: loop exit
PB: predicated region body
PF: predicated region fallthrough
CT: control target
= control target key end

     0   :  { %s92_s0 = inlined_call_operand.vmem [shape: f32[192], index: 0, kind: input, shape index: {}]   ;;  %s93_s1 = inlined_call_operand.hbm [shape: f32[2,96], index: 1, kind: output, shape index: {}]  }
   0x1   :  { %v5_v0 = vld [vmem:[%s92_s0] sm:$0x3] }
   0x2   :  { %6 = vst [vmem:[#allocation3] sm:$0x3] %v5_v0 }
   0x3   :  { %2 = vsyncpa [#allocation1], 0  ;;  %vm8_vm0 = vcmask 785408   ;;  %s65_s0 = smov 32   ;;  %vm17_vm1 = vcmask 261120   ;;  %vm20_vm2 = vcmask 785664  }
   0x4   :  { %s66_s8 = smov [#allocation0]  }
   0x5   :  { %s33_s9 = sshll.u32 %s66_s8, 4  ;;  %s34_s9 = int_to_ptr.vmem [resolvable:$true] %s33_s9 }
   0x6   :  { %s41_s10 = scalar_lea.vmem %s34_s9, 32  ;;  %p46_p1 = scmp.lt.s32.totalorder %s34_s9, %s34_s9 }
   0x7   :  { %p42_p0 = scmp.ne.s32.totalorder %s34_s9, %s41_s10  ;;  %p47_p2 = scmp.lt.s32.totalorder %s41_s10, %s41_s10 }
   0x9   :  { %v10_v1 = vld [vmem:[#allocation3] sm:$0x1]   ;;  %v12_v2 = vld [vmem:[#allocation3 + $0x1] sm:$0x1]   ;;  %p48_p3 = por %p47_p2, %p46_p1 }
   0xa   :  { %v7_v3 = vld [vmem:[#allocation3] sm:$0x1]   ;;  %v14_v4 = vsel %vm8_vm0, %v12_v2, %v10_v1 }
   0xb   :  { %9 = vst.msk [vmem:[#allocation2] sm:$0x1] %vm8_vm0, %v7_v3   ;;  %15 = vrot.lane.b32.xlu0 %v14_v4, %s65_s0  ;;  %p49_p4 = pnand %p48_p3, %p42_p0 }
  0x7d   :  { %v16_v5 = vpop.permute.xlu0 %15  }
  0x7e   :  { %19 = vst.msk [vmem:[#allocation2 + $0x1] sm:$0x1] %vm17_vm1, %v16_v5  }
  0x7f   :  { %22 = vst.msk [vmem:[#allocation2 + $0x1] sm:$0x1] %vm20_vm2, %v16_v5  }
  0x86   :  { %v26_v6 = vld [vmem:[#allocation2] sm:$0x3] }
  0x87   :  { %28 = vst [vmem:[#allocation0] sm:$0x3] %v26_v6 }
  0x88   :  { %52 = shalt.err (!%p49_p4)
}
  0x89   :  { %s53_s13 = scalar_lea.hbm %s93_s1, 32 }
  0x8a   :  { %p54_p5 = scmp.ne.s32.totalorder %s93_s1, %s53_s13  ;;  %p57_p6 = scmp.lt.u32.totalorder %s53_s13, %s93_s1 }
  0x8c   :  { %p59_p7 = pnand %p57_p6, %p54_p5 }
  0x8e   :  { %62 = shalt.err (!%p59_p7)
}
  0x8f   :  { %36 = dma.vmem_to_hbm [thread:$0]  %s34_s9, 32, %s93_s1, [#allocation1]  }
  0x90   :  { %63 = dma.done.wait [#allocation1], 32  }
  0x91   :  { %64 = vsyncadd [#allocation1], 4294967264 }
  0x92   :  { %38 = vsyncpa [#allocation1], 1 }

// kernel: squeeze.5
= control target key start
LH: loop header
LB: loop body
LE: loop exit
PB: predicated region body
PF: predicated region fallthrough
CT: control target
= control target key end

     0   :  { %s8_s6 = smov 3  ;;  %s22_s9 = smov 3  ;;  %s165_s0 = inlined_call_operand.vmem [shape: f32[1,2,8,12], index: 0, kind: input, shape index: {}]   ;;  %s166_s1 = inlined_call_operand.hbm [shape: f32[2,96], index: 1, kind: output, shape index: {}]  }
   0x1   :  { %v72_v0 = vld [vmem:[%s165_s0 + $0x7] ss:$8 sm:%s8_s6]   ;;  %s111_s10 = smov 84   ;;  %v74_v1 = vld [vmem:[%s165_s0 + $0x5] ss:$8 sm:%s22_s9]   ;;  %s15_s13 = smov 3 }
   0x2   :  { %10 = vrot.lane.b32.xlu0 %v72_v0, %s111_s10  ;;  %s112_s14 = smov 60   ;;  %v73_v2 = vld [vmem:[%s165_s0 + $0x6] ss:$8 sm:%s15_s13]   ;;  %s29_s17 = smov 3 }
   0x3   :  { %24 = vrot.lane.b32.xlu1 %v74_v1, %s112_s14 }
   0x4   :  { %2 = vsyncpa [#allocation1], 0  ;;  %v75_v3 = vld [vmem:[%s165_s0 + $0x4] ss:$8 sm:%s29_s17]   ;;  %s36_s20 = smov 3  ;;  %s43_s21 = smov 3 }
   0x5   :  { %s113_s22 = smov 72   ;;  %vm5_vm0 = vcmask 97280   ;;  %s114_s23 = smov 48   ;;  %v76_v4 = vld [vmem:[%s165_s0 + $0x3] ss:$8 sm:%s36_s20]   ;;  %vm12_vm1 = vcmask 786080  }
   0x6   :  { %17 = vrot.lane.b32.xlu0 %v73_v2, %s113_s22  ;;  %s3_s26 = smov 3  ;;  %v77_v5 = vld [vmem:[%s165_s0 + $0x2] ss:$8 sm:%s43_s21]   ;;  %s50_s29 = smov 3  ;;  %vm19_vm2 = vcmask 687680   ;;  %vm26_vm3 = vcmask 589280  }
   0x7   :  { %31 = vrot.lane.b32.xlu1 %v75_v3, %s114_s23  ;;  %v4_v6 = vld [vmem:[%s165_s0] ss:$8 sm:%s3_s26]   ;;  %s115_s3 = smov 36   ;;  %s116_s4 = smov 24   ;;  %vm33_vm4 = vcmask 490880   ;;  %vm40_vm5 = vcmask 392480  }
   0x8   :  { %6 = vst.msk [vmem:[#allocation2] sm:$0x3] %vm5_vm0, %v4_v6   ;;  %v78_v7 = vld [vmem:[%s165_s0 + $0x1] ss:$8 sm:%s50_s29]   ;;  %s117_s0 = smov 12   ;;  %vm47_vm6 = vcmask 294080  }
   0x9   :  { %vm54_vm7 = vcmask 195680   ;;  %s118_s7 = smov [#allocation0]  }
   0xa   :  { %38 = vrot.lane.b32.xlu0 %v76_v4, %s115_s3  ;;  %s66_s8 = sshll.u32 %s118_s7, 4  ;;  %s67_s8 = int_to_ptr.vmem [resolvable:$true] %s66_s8 }
   0xb   :  { %45 = vrot.lane.b32.xlu1 %v77_v5, %s116_s4  ;;  %s87_s9 = scalar_lea.vmem %s67_s8, 32  ;;  %p92_p1 = scmp.lt.s32.totalorder %s67_s8, %s67_s8 }
   0xc   :  { %p88_p0 = scmp.ne.s32.totalorder %s67_s8, %s87_s9  ;;  %p93_p2 = scmp.lt.s32.totalorder %s87_s9, %s87_s9 }
   0xe   :  { %52 = vrot.lane.b32.xlu0 %v78_v7, %s117_s0  ;;  %p94_p3 = por %p93_p2, %p92_p1 }
  0x10   :  { %p95_p4 = pnand %p94_p3, %p88_p0 }
  0x74   :  { %v11_v8 = vpop.permute.xlu0 %10  }
  0x75   :  { %13 = vst.msk [vmem:[#allocation2] sm:$0x3] %vm12_vm1, %v11_v8   ;;  %v25_v9 = vpop.permute.xlu1 %24  }
  0x78   :  { %v18_v10 = vpop.permute.xlu0 %17  }
  0x79   :  { %20 = vst.msk [vmem:[#allocation2] sm:$0x3] %vm19_vm2, %v18_v10   ;;  %v32_v11 = vpop.permute.xlu1 %31  }
  0x7a   :  { %27 = vst.msk [vmem:[#allocation2] sm:$0x3] %vm26_vm3, %v25_v9  }
  0x7b   :  { %34 = vst.msk [vmem:[#allocation2] sm:$0x3] %vm33_vm4, %v32_v11  }
  0x7c   :  { %v39_v12 = vpop.permute.xlu0 %38  }
  0x7d   :  { %41 = vst.msk [vmem:[#allocation2] sm:$0x3] %vm40_vm5, %v39_v12   ;;  %v46_v13 = vpop.permute.xlu1 %45  }
  0x7e   :  { %48 = vst.msk [vmem:[#allocation2] sm:$0x3] %vm47_vm6, %v46_v13  }
  0x80   :  { %v53_v14 = vpop.permute.xlu0 %52  }
  0x81   :  { %55 = vst.msk [vmem:[#allocation2] sm:$0x3] %vm54_vm7, %v53_v14  }
  0x88   :  { %v59_v15 = vld [vmem:[#allocation2] sm:$0x3] }
  0x89   :  { %61 = vst [vmem:[#allocation0] sm:$0x3] %v59_v15 }
  0x8a   :  { %98 = shalt.err (!%p95_p4)
}
  0x8b   :  { %s99_s12 = scalar_lea.hbm %s166_s1, 32 }
  0x8c   :  { %p100_p5 = scmp.ne.s32.totalorder %s166_s1, %s99_s12  ;;  %p103_p6 = scmp.lt.u32.totalorder %s99_s12, %s166_s1 }
  0x8e   :  { %p105_p7 = pnand %p103_p6, %p100_p5 }
  0x90   :  { %108 = shalt.err (!%p105_p7)
}
  0x91   :  { %69 = dma.vmem_to_hbm [thread:$0]  %s67_s8, 32, %s166_s1, [#allocation1]  }
  0x92   :  { %109 = dma.done.wait [#allocation1], 32  }
  0x93   :  { %110 = vsyncadd [#allocation1], 4294967264 }
  0x94   :  { %71 = vsyncpa [#allocation1], 1 }

// kernel: fno2d_forward.7
= control target key start
LH: loop header
LB: loop body
LE: loop exit
PB: predicated region body
PF: predicated region fallthrough
CT: control target
= control target key end

     0   :  { %s1171_s0 = inlined_call_operand.hbm [shape: bf16[16,192], index: 0, kind: input, shape index: {}]   ;;  %s1172_s1 = inlined_call_operand.hbm [shape: bf16[16,192], index: 1, kind: input, shape index: {}]   ;;  %s1173_s2 = inlined_call_operand.hbm [shape: bf16[16,16], index: 2, kind: input, shape index: {}]   ;;  %s1174_s3 = inlined_call_operand.hbm [shape: f32[16,1], index: 3, kind: input, shape index: {}]   ;;  %s1175_s4 = inlined_call_operand.hbm [shape: bf16[16,192], index: 4, kind: output, shape index: {}]  }
   0x1   :  { %1184 = sst [smem:[#allocation16_spill]] %s1171_s0 }
   0x2   :  { %1185 = sst [smem:[#allocation17_spill]] %s1173_s2 }
   0x3   :  { %9 = vsyncpa [#allocation3], 0 }
   0x4   :  { %11 = vsyncpa [#allocation3 + $0x1], 0 }
   0x5   :  { %12 = vsyncpa [#allocation6], 0 }
   0x6   :  { %14 = vsyncpa [#allocation6 + $0x1], 0 }
   0x7   :  { %15 = vsyncpa [#allocation9], 0 }
   0x8   :  { %16 = vsyncpa [#allocation4], 0 }
   0x9   :  { %18 = vsyncpa [#allocation4 + $0x1], 0  ;;  %s878_s15 = smov 0   ;;  %s880_s16 = smov 0  }
   0xa   :  { %s882_s17 = smov 0   ;;  %s884_s18 = smov 0  }
   0xb LB: > { %s899_s19 = sadd.s32 4294967295, %s836_s18   ;;  %s510_s20 = sadd.s32 4294967294, %s836_s18   ;;  %s836_s18 = sphi %s884_s18, %s1212_s18   ;;  %s832_s17 = sphi %s882_s17, %s1211_s17   ;;  %s828_s16 = sphi %s880_s16, %s1210_s16   ;;  %s824_s15 = sphi %s878_s15, %s1209_s15  }
   0xc   : > { %s903_s21 = sadd.s32 1, %s836_s18   ;;  %s31_s22 = sadd.s32 1, %s832_s17 }
   0xd   : > { %s28_s23 = ssub.s32 %s836_s18, %s903_s21  ;;  %p38_p0 = scmp.ne.s32.totalorder %s832_s17, %s828_s16 }
   0xe   : > { %p29_p1 = scmp.eq.s32.totalorder %s28_s23, 0  ;;  %p39_p2 = scmp.eq.s32.totalorder %s836_s18, 0 }
   0xf   : > { %p44_p3 = scmp.ne.s32.totalorder %s828_s16, %s824_s15  ;;  %p1176_p4 = scmp.eq.s32.totalorder %s899_s19, 0 }
  0x10   : > { %s915_s24 = scalar_select %p29_p1, %s832_s17, %s31_s22  }
  0x11   : > { %p917_p5 = por %p39_p2, %p38_p0  ;;  %p923_p6 = por %p1176_p4, %p44_p3 }
  0x12   : > { %p136_p7 = scmp.eq.s32.totalorder %s899_s19, 1  ;;  %p142_p8 = scmp.eq.s32.totalorder %s510_s20, 1 }
  0x13   : > { %s1186_s25 = scalar_select %p917_p5, 1, 0 }
  0x14   : > { %s1187_s26 = scalar_select %p923_p6, 1, 0 }
  0x15   : > { %p511_p9 = scmp.ge.s32.totalorder %s836_s18, 1  ;;  %p149_p10 = scmp.lt.s32.totalorder %s836_s18, 3 }
  0x16   : > { %p930_p11 = por %p136_p7, %p38_p0  ;;  %p934_p12 = por %p142_p8, %p44_p3 }
  0x17   : > { %p938_p13 = pnand %p511_p9, %p149_p10  ;;  %s838_s30 = smov [#allocation7]  }
  0x18   : > { %s1188_s27 = scalar_select %p930_p11, 1, 0 }
  0x19   : > { %s1189_s28 = scalar_select %p934_p12, 1, 0 }
  0x1a   : > { %s1190_s29 = scalar_select %p938_p13, 1, 0 }
  0x1b   : > { %p567_p1 = pneg %p938_p13  ;;  %s161_s5 = sshll.u32 %s838_s30, 4  ;;  %s162_s5 = int_to_ptr.vmem [resolvable:$true] %s161_s5 }
  0x1c   : > { %s839_s7 = smov [#allocation8]   ;;  %s1192_s2 = sld [smem:[#allocation17_spill]] }
  0x1d   : > { %p946_p2 = pnand %p567_p1, %p1176_p4  ;;  %s174_s8 = sshll.u32 %s839_s7, 4  ;;  %s175_s8 = int_to_ptr.vmem [resolvable:$true] %s174_s8 }
  0x1f   : > { %p644_p8 = pneg %p946_p2 }
  0x22   : > { %s642_s11 = scalar_lea.hbm %s1192_s2, 128 }
  0x23   : > { %p643_p7 = scmp.ne.s32.totalorder %s1192_s2, %s642_s11  ;;  %p649_p1 = scmp.lt.u32.totalorder %s642_s11, %s1192_s2 }
  0x25   : > { %p645_p9 = pnand %p644_p8, %p643_p7 }
  0x27   : > { %p646_p10 = pneg %p645_p9 }
  0x29   : > { %p651_p0 = pnand %p649_p1, %p646_p10 }
  0x2b   : > { %654 = shalt.err (!%p651_p0)
}
  0x2c   : > { %s655_s22 = scalar_lea.vmem %s162_s5, 128  ;;  %p663_p11 = scmp.lt.s32.totalorder %s162_s5, %s162_s5 }
  0x2d   : > { %p656_p4 = scmp.ne.s32.totalorder %s162_s5, %s655_s22  ;;  %p664_p6 = scmp.lt.s32.totalorder %s655_s22, %s655_s22 }
  0x2f   : > { %p658_p3 = pnand %p656_p4, %p644_p8  ;;  %p665_p13 = por %p664_p6, %p663_p11 }
  0x31   : > { %p659_p12 = pneg %p658_p3 }
  0x33   : > { %p666_p5 = pnand %p665_p13, %p659_p12 }
  0x35   : > { %669 = shalt.err (!%p666_p5)
}
  0x36   : > { %s1181_s23 = smov 64   ;;  %s841_s30 = smov 4  }
  0x37   : > { %570 = dma.hbm_to_vmem [thread:$0]  (!%p946_p2), %s1192_s2, 128, %s162_s5, [#allocation6], %s1181_s23, %s1181_s23, %s841_s30  }
  0x38   : > { %p1193_p4 = scmp.ne.s32.totalorder %s1186_s25, 0  ;;  %p1194_p0 = scmp.lt.s32.totalorder %s836_s18, 2 }
  0x39   : > { %s188_s11 = sand.u32 1, %s832_s17   ;;  %s670_s14 = scalar_lea.hbm %s1174_s3, 256 }
  0x3a   : > { %p981_p6 = pnand %p1194_p0, %p1193_p4  ;;  %p671_p5 = scmp.ne.s32.totalorder %s1174_s3, %s670_s14 }
  0x3b   : > { %p677_p13 = scmp.lt.u32.totalorder %s670_s14, %s1174_s3 }
  0x3c   : > { %s1195_s10 = scalar_select %p981_p6, 1, 0 }
  0x3d   : > { %p673_p11 = pnand %p671_p5, %p644_p8 }
  0x3f   : > { %p674_p12 = pneg %p673_p11 }
  0x41   : > { %p679_p3 = pnand %p677_p13, %p674_p12 }
  0x43   : > { %682 = shalt.err (!%p679_p3)
}
  0x44   : > { %s683_s7 = scalar_lea.vmem %s175_s8, 256  ;;  %p691_p1 = scmp.lt.s32.totalorder %s175_s8, %s175_s8 }
  0x45   : > { %p684_p7 = scmp.ne.s32.totalorder %s175_s8, %s683_s7  ;;  %p692_p4 = scmp.lt.s32.totalorder %s683_s7, %s683_s7 }
  0x47   : > { %p686_p9 = pnand %p684_p7, %p644_p8  ;;  %p693_p0 = por %p692_p4, %p691_p1 }
  0x49   : > { %p687_p10 = pneg %p686_p9 }
  0x4b   : > { %p694_p6 = pnand %p693_p0, %p687_p10 }
  0x4d   : > { %697 = shalt.err (!%p694_p6)
}
  0x4e   : > { %s842_s9 = smov 128   ;;  %s843_s12 = smov 8  }
  0x4f   : > { %573 = dma.hbm_to_vmem [thread:$0]  (!%p946_p2), %s1174_s3, 256, %s175_s8, [#allocation9], %s842_s9, %s842_s9, %s843_s12  }
  0x50   : > { %s1008_s20 = sshll.u32 %s188_s11, 3  ;;  %s1183_s22 = sshll.u32 %s836_s18, 6 }
  0x51   : > { %s1196_s0 = sld [smem:[#allocation16_spill]]  ;;  %s192_s6 = scalar_lea.vmem [#allocation2], %s1008_s20 }
  0x52   : > { %s198_s23 = sshll.u32 %s192_s6, 4  ;;  %s1021_s13 = scalar_lea.sflag [#allocation3], %s188_s11  ;;  %s1019_s23 = int_to_ptr.vmem [resolvable:$true] %s198_s23 }
  0x53   : > { %p1197_p8 = scmp.ne.s32.totalorder %s1195_s10, 0 }
  0x55   : > { %p700_p6 = pneg %p1197_p8 }
  0x57   : > { %s1016_s7 = scalar_lea.hbm %s1196_s0, %s1183_s22  ;;  %s703_s25 = scalar_lea.hbm %s1196_s0, 256 }
  0x58   : > { %s698_s8 = scalar_lea.hbm %s1016_s7, 128  ;;  %p704_p12 = scmp.lt.u32.totalorder %s1016_s7, %s1196_s0 }
  0x59   : > { %p699_p2 = scmp.ne.s32.totalorder %s1016_s7, %s698_s8  ;;  %p705_p13 = scmp.lt.u32.totalorder %s703_s25, %s698_s8 }
  0x5a   : > { %p707_p7 = scmp.lt.u32.totalorder %s698_s8, %s1016_s7 }
  0x5b   : > { %p701_p5 = pnand %p700_p6, %p699_p2  ;;  %p706_p3 = por %p705_p13, %p704_p12 }
  0x5d   : > { %p702_p11 = pneg %p701_p5  ;;  %p708_p9 = por %p707_p7, %p706_p3 }
  0x5f   : > { %p709_p10 = pnand %p708_p9, %p702_p11 }
  0x61   : > { %712 = shalt.err (!%p709_p10)
}
  0x62   : > { %s713_s11 = scalar_lea.vmem %s1019_s23, 128  ;;  %s844_s6 = smov [#allocation2]  }
  0x63   : > { %p714_p1 = scmp.ne.s32.totalorder %s1019_s23, %s713_s11  ;;  %s718_s12 = sshll.u32 %s844_s6, 4  ;;  %s719_s12 = int_to_ptr.vmem [resolvable:$false] %s718_s12 }
  0x64   : > { %s720_s22 = scalar_lea.vmem %s719_s12, 256  ;;  %p721_p2 = scmp.lt.s32.totalorder %s1019_s23, %s719_s12 }
  0x65   : > { %p716_p4 = pnand %p714_p1, %p700_p6  ;;  %p722_p5 = scmp.lt.s32.totalorder %s720_s22, %s713_s11 }
  0x67   : > { %p717_p0 = pneg %p716_p4  ;;  %p723_p12 = por %p722_p5, %p721_p2 }
  0x69   : > { %p724_p13 = pnand %p723_p12, %p717_p0 }
  0x6b   : > { %727 = shalt.err (!%p724_p13)
}
  0x6c   : > { %s1198_s8 = smov 64   ;;  %s1199_s14 = sshll.u32 %s836_s18, 6 }
  0x6d   : > { %577 = dma.hbm_to_vmem [thread:$0]  (!%p1197_p8), %s1016_s7, 128, %s1019_s23, %s1021_s13, %s842_s9, %s1198_s8, %s841_s30  }
  0x6e   : > { %s1057_s11 = scalar_lea.hbm %s1172_s1, %s1199_s14  ;;  %s212_s6 = scalar_lea.vmem [#allocation5], %s1008_s20 }
  0x6f   : > { %s218_s12 = sshll.u32 %s212_s6, 4  ;;  %s208_s22 = sand.u32 1, %s836_s18   ;;  %s1060_s12 = int_to_ptr.vmem [resolvable:$true] %s218_s12 }
  0x70   : > { %s1063_s0 = scalar_lea.sflag [#allocation6], %s208_s22  ;;  %s728_s2 = scalar_lea.hbm %s1057_s11, 128 }
  0x71   : > { %p729_p11 = scmp.ne.s32.totalorder %s1057_s11, %s728_s2  ;;  %s733_s13 = scalar_lea.hbm %s1172_s1, 256 }
  0x72   : > { %p734_p9 = scmp.lt.u32.totalorder %s1057_s11, %s1172_s1  ;;  %p735_p10 = scmp.lt.u32.totalorder %s733_s13, %s728_s2 }
  0x73   : > { %p731_p3 = pnand %p729_p11, %p700_p6  ;;  %p737_p4 = scmp.lt.u32.totalorder %s728_s2, %s1057_s11 }
  0x74   : > { %p736_p1 = por %p735_p10, %p734_p9 }
  0x75   : > { %p732_p7 = pneg %p731_p3 }
  0x76   : > { %p738_p0 = por %p737_p4, %p736_p1 }
  0x78   : > { %p739_p2 = pnand %p738_p0, %p732_p7 }
  0x7a   : > { %742 = shalt.err (!%p739_p2)
}
  0x7b   : > { %s743_s20 = scalar_lea.vmem %s1060_s12, 128  ;;  %s845_s5 = smov [#allocation5]  }
  0x7c   : > { %p744_p5 = scmp.ne.s32.totalorder %s1060_s12, %s743_s20  ;;  %s748_s6 = sshll.u32 %s845_s5, 4  ;;  %s749_s6 = int_to_ptr.vmem [resolvable:$false] %s748_s6 }
  0x7d   : > { %s750_s22 = scalar_lea.vmem %s749_s6, 256  ;;  %p751_p11 = scmp.lt.s32.totalorder %s1060_s12, %s749_s6 }
  0x7e   : > { %p746_p12 = pnand %p744_p5, %p700_p6  ;;  %p752_p3 = scmp.lt.s32.totalorder %s750_s22, %s743_s20 }
  0x80   : > { %p747_p13 = pneg %p746_p12  ;;  %p753_p9 = por %p752_p3, %p751_p11 }
  0x82   : > { %p754_p10 = pnand %p753_p9, %p747_p13 }
  0x84   : > { %757 = shalt.err (!%p754_p10)
}
  0x85   : > { %580 = dma.hbm_to_vmem [thread:$0]  (!%p1197_p8), %s1057_s11, 128, %s1060_s12, %s1063_s0, %s842_s9, %s1198_s8, %s841_s30  }
  0x86   : > { %p1200_p6 = scmp.ne.s32.totalorder %s1190_s29, 0 }
  0x87   : > { %s1095_s2 = sand.u32 (!%p1200_p6), 1, %s828_s16   ;;  %p1201_p7 = scmp.ne.s32.totalorder (!%p1200_p6), %s1187_s26, 0 }
  0x88   : > { %230 = sbr.rel (%p1200_p6) target bundleno = 412 (0x19c), region = 36  ;;  %s1098_s23 = sshll.u32 (!%p1200_p6), %s1095_s2, 3 }
  0x89   : > { %s233_s10 = scalar_lea.sflag (!%p1200_p6), [#allocation3], %s1095_s2  ;;  %s236_s7 = scalar_lea.vmem (!%p1200_p6), [#allocation2], %s1098_s23 }
  0x8f   : > { %803 = dma.done.wait (%p1201_p7), %s233_s10, 128  }
  0x90   : > { %805 = vsyncadd (%p1201_p7), %s233_s10, 4294967168  ;;  %s241_s0 = sand.u32 1, %s899_s19   ;;  %s245_s30 = scalar_lea.vmem [#allocation5], %s1098_s23 }
  0x91   : > { %s242_s29 = scalar_lea.sflag [#allocation6], %s241_s0 }
  0x92   : > { %807 = dma.done.wait (%p1201_p7), %s242_s29, 128  }
  0x93   : > { %809 = vsyncadd (%p1201_p7), %s242_s29, 4294967168  ;;  %p1202_p8 = scmp.eq.s32.totalorder %s899_s19, 0 }
  0x95   : > { %811 = dma.done.wait (%p1202_p8), [#allocation6], 128   ;;  %p1203_p1 = pmov %p1202_p8 }
  0x97   : > { %813 = vsyncadd (%p1203_p1), [#allocation6], 4294967168  ;;  %p1204_p4 = pmov %p1203_p1 }
  0x98   : > { %p1205_p0 = pmov %p1203_p1 }
  0x99   : > { %815 = dma.done.wait (%p1204_p4), [#allocation9], 256  }
  0x9a   : > { %817 = vsyncadd (%p1205_p0), [#allocation9], 4294967040  ;;  %v846_v0 = vmov 0.0   ;;  %vm847_vm0 = vmmov 0   ;;  %v848_v1 = vmov 0   ;;  %v636_v2 = vld [vmem:[%s236_s7] sm:$0xff]  }
  0x9b   : > { %547 = vmatprep.subr.bf16.mxu0 %v846_v0  ;;  %549 = vmatprep.mubr.msk.bf16.mxu0 %vm847_vm0, %v846_v0  ;;  %v637_v3 = vld [vmem:[#allocation7] sm:$0xff]   ;;  %vm311_vm1 = vcmask 130048   ;;  %v288_v4 = vld [vmem:[#allocation8] sm:$0xff]  ;;  %v289_v5 = vld [vmem:[#allocation8 + $0x8] sm:$0xff]  ;;  %s531_s26 = sshll.u32 %s899_s19, 6  ;;  %s282_s9 = scalar_lea.vmem [#allocation10], %s1098_s23 }
  0x9c   : > { %635 = vset.pattern.permute.xlu0 %v848_v1  ;;  %548 = vmatpush3.bf16.msra.mxu0 %v636_v2  ;;  %v537_v7 = vld [vmem:[%s245_s30] sm:$0xff]   ;;  %s395_s8 = sshll.u32 %s282_s9, 4  ;;  %s1125_s13 = scalar_lea.hbm %s1175_s4, %s531_s26  ;;  %s1127_s8 = int_to_ptr.vmem [resolvable:$true] %s395_s8 }
  0x9d   : > { %292 = vperm.xlu0 %635, %v288_v4   ;;  %v538_v8 = vunpack.c.l.bf16 %v537_v7  ;;  %v539_v12 = vunpack.c.h.bf16 %v537_v7  ;;  %s383_s19 = scalar_lea.sflag [#allocation4], %s1095_s2  ;;  %s758_s14 = scalar_lea.vmem %s1127_s8, 128 }
  0x9e   : > { %p759_p2 = scmp.ne.s32.totalorder %s1127_s8, %s758_s14  ;;  %p1206_p5 = scmp.ne.s32.totalorder %s1188_s27, 0 }
  0x9f   : > { %550 = vmatmul.mubr.msk.bf16.vlgmr.msra.gmra.mrb[0].mxu0 %vm311_vm1, %v637_v3  ;;  %s849_s25 = smov [#allocation10]  }
  0xa0   : > { %p760_p12 = pnand %p759_p2, %p1206_p5  ;;  %s762_s20 = sshll.u32 %s849_s25, 4  ;;  %s763_s20 = int_to_ptr.vmem [resolvable:$false] %s762_s20 }
  0xa1   : > { %297 = vperm.xlu0 %635, %v289_v5   ;;  %s764_s5 = scalar_lea.vmem %s763_s20, 256  ;;  %p765_p11 = scmp.lt.s32.totalorder %s1127_s8, %s763_s20 }
  0xa2   : > { %p761_p13 = pneg %p760_p12  ;;  %p766_p3 = scmp.lt.s32.totalorder %s764_s5, %s758_s14 }
  0xa4   : > { %p767_p9 = por %p766_p3, %p765_p11 }
  0xa6   : > { %p768_p10 = pnand %p767_p9, %p761_p13 }
 0x11c   : > { %v293_v6 = vpop.permute.xlu0 %292 }
 0x120   : > { %v298_v13 = vpop.permute.xlu0 %297 }
 0x172   : > { %v349_v9 = vpop.f32.mrb[0].mxu0 }
 0x173   : > { %v350_v10 = vadd.f32 %v349_v9, %v293_v6  ;;  %v551_v11 = vpop.f32.mrb[1].mxu0 }
 0x174   : > { %v352_v14 = vpop.f32.mrb[2].mxu0 }
 0x175   : > { %v360_v15 = vadd.f32 %v538_v8, %v350_v10  ;;  %v353_v16 = vadd.f32 %v352_v14, %v298_v13  ;;  %v552_v17 = vpop.f32.mrb[3].mxu0 }
 0x177   : > { %v364_v18 = vmul.f32 0.70710677, %v360_v15  ;;  %v361_v19 = vadd.f32 %v539_v12, %v353_v16  ;;  %v362_v24 = vmul.f32 0.5, %v360_v15 }
 0x179   : > { %638 = verf.f32 %v364_v18  ;;  %v365_v20 = vmul.f32 0.70710677, %v361_v19  ;;  %v363_v25 = vmul.f32 0.5, %v361_v19 }
 0x17b   : > { %640 = verf.f32 %v365_v20 }
 0x183   : > { %v639_v21 = vpop.eup %638 }
 0x184   : > { %v368_v22 = vadd.f32 1.0, %v639_v21 }
 0x185   : > { %v641_v23 = vpop.eup %640 }
 0x186   : > { %v369_v26 = vadd.f32 1.0, %v641_v23  ;;  %v370_v27 = vmul.f32 %v368_v22, %v362_v24 }
 0x188   : > { %v371_v28 = vmul.f32 %v369_v26, %v363_v25 }
 0x18a   : > { %v543_v29 = vpack.c.bf16 %v371_v28, %v370_v27 }
 0x18c   : > { %544 = vst [vmem:[%s282_s9] sm:$0xff] %v543_v29  }
 0x18d   : > { %771 = shalt.err (!%p768_p10)
}
 0x18e   : > { %s772_s6 = scalar_lea.hbm %s1125_s13, 128  ;;  %s776_s10 = scalar_lea.hbm %s1175_s4, 256 }
 0x18f   : > { %p773_p6 = scmp.ne.s32.totalorder %s1125_s13, %s772_s6  ;;  %p777_p1 = scmp.lt.u32.totalorder %s1125_s13, %s1175_s4 }
 0x190   : > { %p778_p4 = scmp.lt.u32.totalorder %s776_s10, %s772_s6  ;;  %p780_p2 = scmp.lt.u32.totalorder %s772_s6, %s1125_s13 }
 0x191   : > { %p774_p7 = pnand %p773_p6, %p1206_p5 }
 0x192   : > { %p779_p0 = por %p778_p4, %p777_p1 }
 0x193   : > { %p775_p8 = pneg %p774_p7 }
 0x194   : > { %p781_p12 = por %p780_p2, %p779_p0 }
 0x196   : > { %p782_p13 = pnand %p781_p12, %p775_p8 }
 0x198   : > { %785 = shalt.err (!%p782_p13)
}
 0x199   : > { %s850_s29 = smov 64   ;;  %s851_s30 = smov 128  }
 0x19a   : > { %s852_s26 = smov 4  }
 0x19b   : > { %565 = dma.vmem_to_hbm [thread:$0]  (%p1206_p5), %s1127_s8, 128, %s1125_s13, %s383_s19, %s850_s29, %s851_s30, %s852_s26  }
 0x19c PF: > { %s410_s9 = sand.u32 1, %s824_s15   ;;  %p1207_p11 = scmp.ne.s32.totalorder %s1189_s28, 0 }
 0x19d   : > { %p1208_p3 = scmp.ge.s32.totalorder %s836_s18, 2  ;;  %s411_s11 = scalar_lea.sflag [#allocation4], %s410_s9 }
 0x19f   : > { %p582_p9 = pnand %p1208_p3, %p1207_p11 }
 0x1a1   : > { %819 = dma.done.wait (!%p582_p9), %s411_s11, 128  }
 0x1a2   : > { %821 = vsyncadd (!%p582_p9), %s411_s11, 4294967168  ;;  %p21_p10 = scmp.ge.s32.totalorder %s903_s21, 4   ;;  %s1209_s15 = smov %s828_s16 }
 0x1a3   : > { %s1210_s16 = smov %s832_s17  ;;  %s1211_s17 = smov %s915_s24 }
 0x1a4   : > { %s1212_s18 = smov %s903_s21  ;;  %23 = sbr.rel (!%p21_p10) target bundleno = 11 (0xb), region = 102 }
 0x1ab   :  { %416 = vsyncpa [#allocation3], 1 }
 0x1ac   :  { %418 = vsyncpa [#allocation3 + $0x1], 1 }
 0x1ad   :  { %419 = vsyncpa [#allocation6], 1 }
 0x1ae   :  { %421 = vsyncpa [#allocation6 + $0x1], 1 }
 0x1af   :  { %422 = vsyncpa [#allocation9], 1 }
 0x1b0   :  { %423 = vsyncpa [#allocation4], 1 }
 0x1b1   :  { %425 = vsyncpa [#allocation4 + $0x1], 1 }

// kernel: fno2d_forward.11
= control target key start
LH: loop header
LB: loop body
LE: loop exit
PB: predicated region body
PF: predicated region fallthrough
CT: control target
= control target key end

     0   :  { %10 = vsyncpa [#allocation3], 0  ;;  %s1649_s0 = inlined_call_operand.hbm [shape: bf16[16,192], index: 0, kind: input, shape index: {}]   ;;  %s1650_s1 = inlined_call_operand.hbm [shape: bf16[128,16], index: 1, kind: input, shape index: {}]   ;;  %s1651_s2 = inlined_call_operand.hbm [shape: f32[128,1], index: 2, kind: input, shape index: {}]   ;;  %s1652_s3 = inlined_call_operand.hbm [shape: bf16[4,128], index: 3, kind: input, shape index: {}]   ;;  %s1653_s4 = inlined_call_operand.hbm [shape: f32[4,1], index: 4, kind: input, shape index: {}]   ;;  %s1654_s5 = inlined_call_operand.hbm [shape: f32[4,192], index: 5, kind: output, shape index: {}]  }
   0x1   :  { %12 = vsyncpa [#allocation3 + $0x1], 0 }
   0x2   :  { %13 = vsyncpa [#allocation6], 0 }
   0x3   :  { %14 = vsyncpa [#allocation9], 0 }
   0x4   :  { %15 = vsyncpa [#allocation4], 0 }
   0x5   :  { %17 = vsyncpa [#allocation4 + $0x1], 0  ;;  %s1328_s18 = smov 0   ;;  %s1330_s19 = smov 0  }
   0x6   :  { %s1332_s20 = smov 0   ;;  %s1334_s21 = smov 0  }
   0x7 LB: > { %s1349_s22 = sadd.s32 4294967295, %s1283_s21   ;;  %s837_s23 = sadd.s32 4294967294, %s1283_s21   ;;  %s1283_s21 = sphi %s1334_s21, %s1679_s21   ;;  %s1279_s20 = sphi %s1332_s20, %s1678_s20   ;;  %s1275_s19 = sphi %s1330_s19, %s1677_s19   ;;  %s1271_s18 = sphi %s1328_s18, %s1676_s18  }
   0x8   : > { %p43_p0 = scmp.ne.s32.totalorder %s1275_s19, %s1271_s18  ;;  %p1655_p1 = scmp.eq.s32.totalorder %s1349_s22, 0 }
   0x9   : > { %p157_p3 = scmp.eq.s32.totalorder %s837_s23, 1  ;;  %p838_p5 = scmp.ge.s32.totalorder %s1283_s21, 1 }
   0xa   : > { %p1358_p4 = por %p1655_p1, %p43_p0  ;;  %p164_p7 = scmp.lt.s32.totalorder %s1283_s21, 3 }
   0xb   : > { %p1363_p6 = por %p157_p3, %p43_p0  ;;  %s1285_s27 = smov [#allocation5]  }
   0xc   : > { %s1659_s24 = scalar_select %p1358_p4, 1, 0 }
   0xd   : > { %s1660_s25 = scalar_select %p1363_p6, 1, 0 }
   0xe   : > { %p1368_p8 = pnand %p838_p5, %p164_p7  ;;  %s176_s28 = sshll.u32 %s1285_s27, 4  ;;  %s1372_s28 = int_to_ptr.vmem [resolvable:$true] %s176_s28 }
   0xf   : > { %s1286_s30 = smov [#allocation8]   ;;  %s1287_s7 = smov [#allocation7]  }
  0x10   : > { %s1661_s26 = scalar_select %p1368_p8, 1, 0 }
  0x11   : > { %p950_p9 = pneg %p1368_p8  ;;  %s203_s6 = sshll.u32 %s1286_s30, 4  ;;  %s1383_s6 = int_to_ptr.vmem [resolvable:$true] %s203_s6 }
  0x12   : > { %s1385_s8 = sshll.u32 %s1287_s7, 4  ;;  %s1067_s11 = scalar_lea.hbm %s1650_s1, 1024  ;;  %s190_s8 = int_to_ptr.vmem [resolvable:$true] %s1385_s8 }
  0x13   : > { %p1379_p11 = pnand %p950_p9, %p1655_p1  ;;  %p1068_p12 = scmp.ne.s32.totalorder %s1650_s1, %s1067_s11 }
  0x14   : > { %p1074_p5 = scmp.lt.u32.totalorder %s1067_s11, %s1650_s1 }
  0x15   : > { %p1395_p13 = pneg %p1379_p11 }
  0x17   : > { %p1070_p0 = pnand %p1395_p13, %p1068_p12 }
  0x19   : > { %p1071_p3 = pneg %p1070_p0 }
  0x1b   : > { %p1076_p7 = pnand %p1074_p5, %p1071_p3 }
  0x1d   : > { %1079 = shalt.err (!%p1076_p7)
}
  0x1e   : > { %s1080_s17 = scalar_lea.vmem %s1372_s28, 1024  ;;  %p1088_p2 = scmp.lt.s32.totalorder %s1372_s28, %s1372_s28 }
  0x1f   : > { %p1081_p9 = scmp.ne.s32.totalorder %s1372_s28, %s1080_s17  ;;  %p1089_p6 = scmp.lt.s32.totalorder %s1080_s17, %s1080_s17 }
  0x21   : > { %p1083_p10 = pnand %p1081_p9, %p1395_p13  ;;  %p1090_p12 = por %p1089_p6, %p1088_p2 }
  0x23   : > { %p1084_p1 = pneg %p1083_p10 }
  0x25   : > { %p1091_p0 = pnand %p1090_p12, %p1084_p1 }
  0x27   : > { %1094 = shalt.err (!%p1091_p0)
}
  0x28   : > { %s1658_s23 = smov 64   ;;  %s1289_s27 = smov 4  }
  0x29   : > { %953 = dma.hbm_to_vmem [thread:$0]  (!%p1379_p11), %s1650_s1, 1024, %s1372_s28, [#allocation6], %s1658_s23, %s1658_s23, %s1289_s27  }
  0x2a   : > { %s1095_s11 = scalar_lea.hbm %s1652_s3, 32 }
  0x2b   : > { %p1096_p1 = scmp.ne.s32.totalorder %s1652_s3, %s1095_s11  ;;  %p1102_p10 = scmp.lt.u32.totalorder %s1095_s11, %s1652_s3 }
  0x2d   : > { %p1098_p2 = pnand %p1096_p1, %p1395_p13 }
  0x2f   : > { %p1099_p6 = pneg %p1098_p2 }
  0x31   : > { %p1104_p3 = pnand %p1102_p10, %p1099_p6 }
  0x33   : > { %1107 = shalt.err (!%p1104_p3)
}
  0x34   : > { %s1108_s28 = scalar_lea.vmem %s1383_s6, 32  ;;  %p1116_p12 = scmp.lt.s32.totalorder %s1383_s6, %s1383_s6 }
  0x35   : > { %p1109_p5 = scmp.ne.s32.totalorder %s1383_s6, %s1108_s28  ;;  %p1117_p0 = scmp.lt.s32.totalorder %s1108_s28, %s1108_s28 }
  0x37   : > { %p1111_p7 = pnand %p1109_p5, %p1395_p13  ;;  %p1118_p1 = por %p1117_p0, %p1116_p12 }
  0x39   : > { %p1112_p9 = pneg %p1111_p7 }
  0x3b   : > { %p1119_p2 = pnand %p1118_p1, %p1112_p9 }
  0x3d   : > { %1122 = shalt.err (!%p1119_p2)
}
  0x3e   : > { %959 = dma.hbm_to_vmem [thread:$0]  (!%p1379_p11), %s1652_s3, 32, %s1383_s6, [#allocation9]  }
  0x3f   : > { %s1123_s10 = scalar_lea.hbm %s1651_s2, 2048 }
  0x40   : > { %p1124_p6 = scmp.ne.s32.totalorder %s1651_s2, %s1123_s10  ;;  %p1130_p5 = scmp.lt.u32.totalorder %s1123_s10, %s1651_s2 }
  0x42   : > { %p1126_p10 = pnand %p1124_p6, %p1395_p13 }
  0x44   : > { %p1127_p3 = pneg %p1126_p10 }
  0x46   : > { %p1132_p7 = pnand %p1130_p5, %p1127_p3 }
  0x48   : > { %1135 = shalt.err (!%p1132_p7)
}
  0x49   : > { %s1136_s16 = scalar_lea.vmem %s190_s8, 2048  ;;  %p1144_p1 = scmp.lt.s32.totalorder %s190_s8, %s190_s8 }
  0x4a   : > { %p1137_p9 = scmp.ne.s32.totalorder %s190_s8, %s1136_s16  ;;  %p1145_p2 = scmp.lt.s32.totalorder %s1136_s16, %s1136_s16 }
  0x4c   : > { %p1139_p12 = pnand %p1137_p9, %p1395_p13  ;;  %p1146_p4 = por %p1145_p2, %p1144_p1 }
  0x4e   : > { %p1140_p0 = pneg %p1139_p12 }
  0x50   : > { %p1147_p8 = pnand %p1146_p4, %p1140_p0 }
  0x52   : > { %1150 = shalt.err (!%p1147_p8)
}
  0x53   : > { %s1290_s6 = smov 128   ;;  %s1291_s28 = smov 8  }
  0x54   : > { %956 = dma.hbm_to_vmem [thread:$0]  (!%p1379_p11), %s1651_s2, 2048, %s190_s8, [#allocation6], %s1290_s6, %s1290_s6, %s1291_s28  }
  0x55   : > { %s1292_s7 = smov [#allocation10]   ;;  %s1151_s12 = scalar_lea.hbm %s1653_s4, 64 }
  0x56   : > { %s214_s9 = sshll.u32 %s1292_s7, 4  ;;  %p1152_p4 = scmp.ne.s32.totalorder %s1653_s4, %s1151_s12  ;;  %s215_s9 = int_to_ptr.vmem [resolvable:$true] %s214_s9 }
  0x57   : > { %p1158_p10 = scmp.lt.u32.totalorder %s1151_s12, %s1653_s4 }
  0x58   : > { %p1154_p8 = pnand %p1152_p4, %p1395_p13 }
  0x5a   : > { %p1155_p6 = pneg %p1154_p8 }
  0x5c   : > { %p1160_p3 = pnand %p1158_p10, %p1155_p6 }
  0x5e   : > { %1163 = shalt.err (!%p1160_p3)
}
  0x5f   : > { %s1164_s8 = scalar_lea.vmem %s215_s9, 64  ;;  %p1172_p12 = scmp.lt.s32.totalorder %s215_s9, %s215_s9 }
  0x60   : > { %p1165_p5 = scmp.ne.s32.totalorder %s215_s9, %s1164_s8  ;;  %p1173_p0 = scmp.lt.s32.totalorder %s1164_s8, %s1164_s8 }
  0x62   : > { %p1167_p7 = pnand %p1165_p5, %p1395_p13  ;;  %p1174_p1 = por %p1173_p0, %p1172_p12 }
  0x64   : > { %p1168_p9 = pneg %p1167_p7 }
  0x66   : > { %p1175_p2 = pnand %p1174_p1, %p1168_p9 }
  0x68   : > { %1178 = shalt.err (!%p1175_p2)
}
  0x69   : > { %962 = dma.hbm_to_vmem [thread:$0]  (!%p1379_p11), %s1653_s4, 64, %s215_s9, [#allocation9]  }
  0x6a   : > { %s1482_s14 = sadd.s32 1, %s1283_s21   ;;  %s30_s23 = sadd.s32 1, %s1279_s20 }
  0x6b   : > { %s27_s29 = ssub.s32 %s1283_s21, %s1482_s14  ;;  %p37_p13 = scmp.ne.s32.totalorder %s1279_s20, %s1275_s19 }
  0x6c   : > { %p28_p4 = scmp.eq.s32.totalorder %s27_s29, 0  ;;  %p38_p8 = scmp.eq.s32.totalorder %s1283_s21, 0 }
  0x6d   : > { %p1664_p6 = scmp.eq.s32.totalorder %s1349_s22, 1  ;;  %p975_p3 = scmp.lt.s32.totalorder %s1283_s21, 2 }
  0x6e   : > { %s1498_s7 = scalar_select %p28_p4, %s1279_s20, %s30_s23  }
  0x6f   : > { %p1492_p10 = por %p1664_p6, %p37_p13  ;;  %p39_p5 = por %p38_p8, %p37_p13 }
  0x70   : > { %s225_s10 = sand.u32 1, %s1279_s20   ;;  %s845_s9 = sshll.u32 %s1283_s21, 6 }
  0x71   : > { %s844_s11 = sshll.u32 %s225_s10, 3  ;;  %s1505_s15 = scalar_lea.hbm %s1649_s0, %s845_s9 }
  0x72   : > { %s229_s16 = scalar_lea.vmem [#allocation2], %s844_s11  ;;  %p1509_p11 = pnand %p975_p3, %p39_p5 }
  0x73   : > { %s235_s8 = sshll.u32 %s229_s16, 4  ;;  %s1513_s17 = scalar_lea.sflag [#allocation3], %s225_s10  ;;  %s1507_s8 = int_to_ptr.vmem [resolvable:$true] %s235_s8 }
  0x74   : > { %s1179_s23 = scalar_lea.hbm %s1505_s15, 128  ;;  %p1181_p9 = pneg %p1509_p11 }
  0x75   : > { %p1180_p7 = scmp.ne.s32.totalorder %s1505_s15, %s1179_s23  ;;  %s1184_s9 = scalar_lea.hbm %s1649_s0, 256 }
  0x76   : > { %p1185_p1 = scmp.lt.u32.totalorder %s1505_s15, %s1649_s0  ;;  %p1186_p2 = scmp.lt.u32.totalorder %s1184_s9, %s1179_s23 }
  0x77   : > { %p1182_p12 = pnand %p1181_p9, %p1180_p7  ;;  %p1188_p4 = scmp.lt.u32.totalorder %s1179_s23, %s1505_s15 }
  0x78   : > { %p1187_p13 = por %p1186_p2, %p1185_p1 }
  0x79   : > { %p1183_p0 = pneg %p1182_p12 }
  0x7a   : > { %p1189_p8 = por %p1188_p4, %p1187_p13 }
  0x7c   : > { %p1190_p6 = pnand %p1189_p8, %p1183_p0 }
  0x7e   : > { %1193 = shalt.err (!%p1190_p6)
}
  0x7f   : > { %s1194_s10 = scalar_lea.vmem %s1507_s8, 128  ;;  %s1293_s16 = smov [#allocation2]  }
  0x80   : > { %p1195_p3 = scmp.ne.s32.totalorder %s1507_s8, %s1194_s10  ;;  %s1199_s29 = sshll.u32 %s1293_s16, 4  ;;  %s1200_s29 = int_to_ptr.vmem [resolvable:$false] %s1199_s29 }
  0x81   : > { %s1201_s11 = scalar_lea.vmem %s1200_s29, 256  ;;  %p1202_p12 = scmp.lt.s32.totalorder %s1507_s8, %s1200_s29 }
  0x82   : > { %p1197_p5 = pnand %p1195_p3, %p1181_p9  ;;  %p1203_p1 = scmp.lt.s32.totalorder %s1201_s11, %s1194_s10 }
  0x84   : > { %p1198_p7 = pneg %p1197_p5  ;;  %p1204_p2 = por %p1203_p1, %p1202_p12 }
  0x86   : > { %p1205_p13 = pnand %p1204_p2, %p1198_p7 }
  0x88   : > { %1208 = shalt.err (!%p1205_p13)
}
  0x89   : > { %s1667_s23 = smov 64   ;;  %p1668_p9 = scmp.ne.s32.totalorder %s1661_s26, 0 }
  0x8a   : > { %966 = dma.hbm_to_vmem [thread:$0]  (!%p1509_p11), %s1505_s15, 128, %s1507_s8, %s1513_s17, %s1290_s6, %s1667_s23, %s1289_s27  }
  0x8b   : > { %247 = sbr.rel (%p1668_p9) target bundleno = 654 (0x28e), region = 40  ;;  %s1547_s9 = sand.u32 (!%p1668_p9), 1, %s1275_s19  }
  0x8c   : > { %s847_s12 = sshll.u32 (!%p1668_p9), %s1547_s9, 3  ;;  %s250_s13 = scalar_lea.sflag (!%p1668_p9), [#allocation3], %s1547_s9 }
  0x8d   : > { %s253_s10 = scalar_lea.vmem (!%p1668_p9), [#allocation2], %s847_s12  ;;  %p1669_p0 = scmp.ne.s32.totalorder (!%p1668_p9), %s1659_s24, 0 }
  0x92   : > { %1254 = dma.done.wait (%p1669_p0), %s250_s13, 128  }
  0x93   : > { %1256 = vsyncadd (%p1669_p0), %s250_s13, 4294967168  ;;  %p1670_p4 = scmp.eq.s32.totalorder %s1349_s22, 0 }
  0x95   : > { %1258 = dma.done.wait (%p1670_p4), [#allocation6], 3072   ;;  %p1671_p11 = pmov %p1670_p4 }
  0x96   : > { %p1672_p8 = pmov %p1670_p4 }
  0x97   : > { %1260 = vsyncadd (%p1671_p11), [#allocation6], 4294964224 }
  0x98   : > { %1262 = dma.done.wait (%p1672_p8), [#allocation9], 96   ;;  %p1673_p6 = pmov %p1670_p4 }
  0x99   : > { %v1294_v0 = vmov 0   ;;  %v1026_v1 = vld [vmem:[%s253_s10] sm:$0xff]   ;;  %vm457_vm0 = vcmask 130048   ;;  %v1027_v2 = vld [vmem:[#allocation5] sm:$0xff]   ;;  %v1028_v3 = vld [vmem:[#allocation5 + $0x8] sm:$0xff]   ;;  %v1295_v27 = vmov 0.0  }
  0x9a   : > { %1264 = vsyncadd (%p1673_p6), [#allocation9], 4294967200  ;;  %1024 = vset.pattern.permute.xlu0 %v1294_v0  ;;  %1025 = vset.pattern.permute.xlu1 %v1294_v0  ;;  %v1029_v4 = vld [vmem:[#allocation5 + $0x10] sm:$0xff]   ;;  %v315_v5 = vld [vmem:[#allocation7] sm:$0xff]  ;;  %vm1296_vm1 = vmmov 0   ;;  %s852_s24 = sshll.u32 %s1547_s9, 2 }
  0x9b   : > { %892 = vmatprep.subr.bf16.mxu0 %v1026_v1  ;;  %894 = vmatprep.mubr.msk.bf16.mxu0 %vm457_vm0, %v1027_v2  ;;  %v317_v6 = vld [vmem:[#allocation7 + $0x10] sm:$0xff]  ;;  %v1030_v7 = vld [vmem:[#allocation5 + $0x18] sm:$0xff]   ;;  %v1031_v8 = vld [vmem:[#allocation5 + $0x20] sm:$0xff]   ;;  %s871_s26 = sshll.u32 %s1349_s22, 6  ;;  %s295_s27 = scalar_lea.vmem [#allocation11], %s852_s24 }
  0x9c   : > { %893 = vmatpush3.bf16.msra.mxu0 %v1026_v1  ;;  %333 = vperm.xlu0 %1024, %v315_v5   ;;  %v316_v9 = vld [vmem:[#allocation7 + $0x8] sm:$0xff]  ;;  %v318_v10 = vld [vmem:[#allocation7 + $0x18] sm:$0xff]  ;;  %v319_v11 = vld [vmem:[#allocation7 + $0x20] sm:$0xff]  ;;  %s729_s6 = sshll.u32 %s295_s27, 4  ;;  %s1605_s28 = scalar_lea.hbm %s1654_s5, %s871_s26  ;;  %s1607_s6 = int_to_ptr.vmem [resolvable:$true] %s729_s6 }
  0x9d   : > { %343 = vperm.xlu1 %1025, %v317_v6   ;;  %v320_v12 = vld [vmem:[#allocation7 + $0x28] sm:$0xff]  ;;  %v1033_v14 = vld [vmem:[#allocation5 + $0x30] sm:$0xff]   ;;  %v322_v16 = vld [vmem:[#allocation7 + $0x38] sm:$0xff]  ;;  %910 = vmatprep.subr.bf16.mxu1 %v1295_v27  ;;  %s716_s22 = scalar_lea.sflag [#allocation4], %s1547_s9  ;;  %s1209_s17 = scalar_lea.vmem %s1607_s6, 64 }
  0x9e   : > { %v1032_v13 = vld [vmem:[#allocation5 + $0x28] sm:$0xff]   ;;  %v321_v15 = vld [vmem:[#allocation7 + $0x30] sm:$0xff]  ;;  %v323_v17 = vld [vmem:[#allocation7 + $0x40] sm:$0xff]  ;;  %926 = vmatprep.mubr.msk.bf16.mxu1 %vm1296_vm1, %v1295_v27  ;;  %p1210_p3 = scmp.ne.s32.totalorder %s1607_s6, %s1209_s17  ;;  %s1297_s16 = smov [#allocation11]  }
  0x9f   : > { %895 = vmatmul.mubr.msk.bf16.vlgmr.msra.gmra.mrb[0].mxu0 %vm457_vm0, %v1028_v3  ;;  %v324_v18 = vld [vmem:[#allocation7 + $0x48] sm:$0xff]  ;;  %v1034_v19 = vld [vmem:[#allocation5 + $0x38] sm:$0xff]   ;;  %v325_v20 = vld [vmem:[#allocation7 + $0x50] sm:$0xff]  ;;  %s1213_s29 = sshll.u32 %s1297_s16, 4  ;;  %s1214_s29 = int_to_ptr.vmem [resolvable:$false] %s1213_s29 }
  0xa0   : > { %898 = vmatprep.mubr.msk.bf16.mxu0 %vm457_vm0, %v1029_v4  ;;  %338 = vperm.xlu0 %1024, %v316_v9   ;;  %v326_v21 = vld [vmem:[#allocation7 + $0x58] sm:$0xff]  ;;  %v327_v22 = vld [vmem:[#allocation7 + $0x60] sm:$0xff]  ;;  %v328_v23 = vld [vmem:[#allocation7 + $0x68] sm:$0xff]  ;;  %p1211_p5 = pnand %p1210_p3, %p1492_p10  ;;  %s1215_s11 = scalar_lea.vmem %s1214_s29, 128 }
  0xa1   : > { %348 = vperm.xlu1 %1025, %v318_v10   ;;  %v329_v24 = vld [vmem:[#allocation7 + $0x70] sm:$0xff]  ;;  %v330_v25 = vld [vmem:[#allocation7 + $0x78] sm:$0xff]  ;;  %v668_v26 = vld [vmem:[#allocation10] sm:$0xf]  ;;  %p1216_p12 = scmp.lt.s32.totalorder %s1607_s6, %s1214_s29  ;;  %p1217_p1 = scmp.lt.s32.totalorder %s1215_s11, %s1209_s17 }
  0xa2   : > { %p1212_p7 = pneg %p1211_p5 }
  0xa3   : > { %p1218_p2 = por %p1217_p1, %p1216_p12 }
  0xa4   : > { %353 = vperm.xlu0 %1024, %v319_v11  }
  0xa5   : > { %358 = vperm.xlu1 %1025, %v320_v12   ;;  %p1219_p13 = pnand %p1218_p2, %p1212_p7 }
  0xa7   : > { %899 = vmatmul.mubr.msk.bf16.gmra.mrb[4].mxu0 %vm457_vm0, %v1030_v7 }
  0xa8   : > { %902 = vmatprep.mubr.msk.bf16.mxu0 %vm457_vm0, %v1031_v8  ;;  %363 = vperm.xlu0 %1024, %v321_v15  }
  0xa9   : > { %368 = vperm.xlu1 %1025, %v322_v16  }
  0xac   : > { %373 = vperm.xlu0 %1024, %v323_v17  }
  0xad   : > { %378 = vperm.xlu1 %1025, %v324_v18  }
  0xaf   : > { %903 = vmatmul.mubr.msk.bf16.gmra.mrb[8].mxu0 %vm457_vm0, %v1032_v13 }
  0xb0   : > { %906 = vmatprep.mubr.msk.bf16.mxu0 %vm457_vm0, %v1033_v14  ;;  %383 = vperm.xlu0 %1024, %v325_v20  }
  0xb1   : > { %388 = vperm.xlu1 %1025, %v326_v21  }
  0xb4   : > { %393 = vperm.xlu0 %1024, %v327_v22  }
  0xb5   : > { %398 = vperm.xlu1 %1025, %v328_v23  }
  0xb7   : > { %907 = vmatmul.mubr.msk.bf16.gmra.mrb[12].mxu0 %vm457_vm0, %v1034_v19 }
  0xb8   : > { %403 = vperm.xlu0 %1024, %v329_v24  }
  0xb9   : > { %408 = vperm.xlu1 %1025, %v330_v25  }
  0xbc   : > { %671 = vperm.xlu0 %1024, %v668_v26  }
 0x11b   : > { %v334_v28 = vpop.permute.xlu0 %333 }
 0x11c   : > { %v344_v29 = vpop.permute.xlu1 %343 }
 0x11f   : > { %v339_v30 = vpop.permute.xlu0 %338 }
 0x120   : > { %v349_v31 = vpop.permute.xlu1 %348 }
 0x123   : > { %v354_v32 = vpop.permute.xlu0 %353 }
 0x124   : > { %v359_v33 = vpop.permute.xlu1 %358 }
 0x127   : > { %v364_v34 = vpop.permute.xlu0 %363 }
 0x128   : > { %v369_v40 = vpop.permute.xlu1 %368 }
 0x12b   : > { %v374_v47 = vpop.permute.xlu0 %373 }
 0x12c   : > { %v379_v50 = vpop.permute.xlu1 %378 }
 0x12f   : > { %v384_v58 = vpop.permute.xlu0 %383 }
 0x130   : > { %v389_v0 = vpop.permute.xlu1 %388 }
 0x133   : > { %v394_v9 = vpop.permute.xlu0 %393 }
 0x134   : > { %v399_v24 = vpop.permute.xlu1 %398 }
 0x172   : > { %v896_v35 = vpop.f32.mrb[0].mxu0 }
 0x173   : > { %v525_v36 = vadd.f32 %v896_v35, %v344_v29  ;;  %v516_v37 = vpop.f32.mrb[1].mxu0 }
 0x174   : > { %v517_v38 = vadd.f32 %v516_v37, %v334_v28  ;;  %v897_v39 = vpop.f32.mrb[2].mxu0 }
 0x175   : > { %v597_v41 = vmul.f32 0.70710677, %v525_v36  ;;  %v528_v42 = vadd.f32 %v897_v39, %v349_v31  ;;  %v519_v43 = vpop.f32.mrb[3].mxu0  ;;  %v581_v4 = vmul.f32 0.5, %v525_v36 }
 0x176   : > { %v595_v44 = vmul.f32 0.70710677, %v517_v38  ;;  %v520_v45 = vadd.f32 %v519_v43, %v339_v30  ;;  %v579_v15 = vmul.f32 0.5, %v517_v38 }
 0x177   : > { %1035 = verf.f32 %v597_v41  ;;  %v598_v46 = vmul.f32 0.70710677, %v528_v42  ;;  %v582_v10 = vmul.f32 0.5, %v528_v42 }
 0x178   : > { %1037 = verf.f32 %v595_v44  ;;  %v596_v48 = vmul.f32 0.70710677, %v520_v45  ;;  %v580_v21 = vmul.f32 0.5, %v520_v45 }
 0x179   : > { %1039 = verf.f32 %v598_v46 }
 0x17a   : > { %1041 = verf.f32 %v596_v48  ;;  %v900_v49 = vpop.f32.mrb[4].mxu0  ;;  %v409_v48 = vpop.permute.xlu1 %408 }
 0x17b   : > { %v541_v51 = vadd.f32 %v900_v49, %v364_v34  ;;  %v532_v52 = vpop.f32.mrb[5].mxu0  ;;  %v404_v34 = vpop.permute.xlu0 %403 }
 0x17c   : > { %v1573_v53 = vadd.f32 %v532_v52, %v354_v32  ;;  %v901_v54 = vpop.f32.mrb[6].mxu0 }
 0x17d   : > { %v601_v55 = vmul.f32 0.70710677, %v541_v51  ;;  %v544_v56 = vadd.f32 %v901_v54, %v369_v40  ;;  %v535_v57 = vpop.f32.mrb[7].mxu0  ;;  %v585_v43 = vmul.f32 0.5, %v541_v51 }
 0x17e   : > { %v599_v59 = vmul.f32 0.70710677, %v1573_v53  ;;  %v536_v60 = vadd.f32 %v535_v57, %v359_v33  ;;  %v583_v49 = vmul.f32 0.5, %v1573_v53 }
 0x17f   : > { %1043 = verf.f32 %v601_v55  ;;  %v602_v61 = vmul.f32 0.70710677, %v544_v56  ;;  %v586_v44 = vmul.f32 0.5, %v544_v56 }
 0x180   : > { %1045 = verf.f32 %v599_v59  ;;  %v600_v62 = vmul.f32 0.70710677, %v536_v60 }
 0x181   : > { %v1036_v63 = vpop.eup %1035  ;;  %1047 = verf.f32 %v602_v61 }
 0x182   : > { %v1038_v1 = vpop.eup %1037  ;;  %1049 = verf.f32 %v600_v62  ;;  %v904_v2 = vpop.f32.mrb[8].mxu0  ;;  %v629_v5 = vadd.f32 1.0, %v1036_v63 }
 0x183   : > { %v1040_v3 = vpop.eup %1039  ;;  %v1576_v6 = vadd.f32 %v904_v2, %v384_v58  ;;  %v548_v7 = vpop.f32.mrb[9].mxu0  ;;  %v627_v14 = vadd.f32 1.0, %v1038_v1 }
 0x184   : > { %v1042_v8 = vpop.eup %1041  ;;  %v630_v11 = vadd.f32 1.0, %v1040_v3  ;;  %v1578_v12 = vadd.f32 %v548_v7, %v374_v47  ;;  %v905_v13 = vpop.f32.mrb[10].mxu0  ;;  %v645_v25 = vmul.f32 %v629_v5, %v581_v4 }
 0x185   : > { %v605_v16 = vmul.f32 0.70710677, %v1576_v6  ;;  %v1581_v17 = vadd.f32 %v905_v13, %v389_v0  ;;  %v551_v18 = vpop.f32.mrb[11].mxu0  ;;  %v628_v19 = vadd.f32 1.0, %v1042_v8  ;;  %v643_v29 = vmul.f32 %v627_v14, %v579_v15 }
 0x186   : > { %v646_v20 = vmul.f32 %v630_v11, %v582_v10  ;;  %v603_v22 = vmul.f32 0.70710677, %v1578_v12  ;;  %v1584_v23 = vadd.f32 %v551_v18, %v379_v50  ;;  %v584_v50 = vmul.f32 0.5, %v536_v60 }
 0x187   : > { %1051 = verf.f32 %v605_v16  ;;  %v606_v26 = vmul.f32 0.70710677, %v1581_v17  ;;  %v644_v30 = vmul.f32 %v628_v19, %v580_v21  ;;  %v589_v8 = vmul.f32 0.5, %v1576_v6 }
 0x188   : > { %1053 = verf.f32 %v603_v22  ;;  %v604_v28 = vmul.f32 0.70710677, %v1584_v23  ;;  %v661_v32 = vpack.c.bf16 %v646_v20, %v645_v25  ;;  %v587_v11 = vmul.f32 0.5, %v1578_v12 }
 0x189   : > { %v1044_v31 = vpop.eup %1043  ;;  %1055 = verf.f32 %v606_v26  ;;  %v660_v37 = vpack.c.bf16 %v644_v30, %v643_v29  ;;  %v588_v13 = vmul.f32 0.5, %v1584_v23 }
 0x18a   : > { %v1046_v33 = vpop.eup %1045  ;;  %v633_v35 = vadd.f32 1.0, %v1044_v31  ;;  %1057 = verf.f32 %v604_v28  ;;  %v908_v36 = vpop.f32.mrb[12].mxu0 }
 0x18b   : > { %v1048_v38 = vpop.eup %1047  ;;  %v631_v39 = vadd.f32 1.0, %v1046_v33  ;;  %v573_v40 = vadd.f32 %v908_v36, %v404_v34  ;;  %v564_v41 = vpop.f32.mrb[13].mxu0  ;;  %911 = vmatpush3.bf16.msra.mxu1 %v660_v37 }
 0x18c   : > { %v1050_v42 = vpop.eup %1049  ;;  %v634_v45 = vadd.f32 1.0, %v1048_v38  ;;  %v565_v46 = vadd.f32 %v564_v41, %v394_v9  ;;  %v909_v47 = vpop.f32.mrb[14].mxu0  ;;  %912 = vmatprep.subr.bf16.mxu1 %v1295_v27  ;;  %v649_v57 = vmul.f32 %v633_v35, %v585_v43  ;;  %v590_v9 = vmul.f32 0.5, %v1581_v17  ;;  %v659_v38 = vld [vmem:[#allocation8] sm:$0x3] }
 0x18d   : > { %v632_v52 = vadd.f32 1.0, %v1050_v42  ;;  %v609_v54 = vmul.f32 0.70710677, %v573_v40  ;;  %v567_v55 = vpop.f32.mrb[15].mxu0  ;;  %v576_v61 = vadd.f32 %v909_v47, %v409_v48  ;;  %v647_v62 = vmul.f32 %v631_v39, %v583_v49  ;;  %v672_v39 = vpop.permute.xlu0 %671 }
 0x18e   : > { %v650_v58 = vmul.f32 %v634_v45, %v586_v44  ;;  %v607_v59 = vmul.f32 0.70710677, %v565_v46  ;;  %v568_v56 = vadd.f32 %v567_v55, %v399_v24  ;;  %v593_v23 = vmul.f32 0.5, %v573_v40 }
 0x18f   : > { %v648_v51 = vmul.f32 %v632_v52, %v584_v50  ;;  %1059 = verf.f32 %v609_v54  ;;  %v610_v63 = vmul.f32 0.70710677, %v576_v61  ;;  %913 = vmatpush3.bf16.msra.mxu1 %v661_v32  ;;  %v594_v26 = vmul.f32 0.5, %v576_v61 }
 0x190   : > { %1061 = verf.f32 %v607_v59  ;;  %v663_v0 = vpack.c.bf16 %v650_v58, %v649_v57  ;;  %v608_v53 = vmul.f32 0.70710677, %v568_v56  ;;  %914 = vmatprep.subr.bf16.mxu1 %v1295_v27  ;;  %v591_v29 = vmul.f32 0.5, %v565_v46 }
 0x191   : > { %v1052_v1 = vpop.eup %1051  ;;  %v662_v60 = vpack.c.bf16 %v648_v51, %v647_v62  ;;  %1063 = verf.f32 %v610_v63  ;;  %v592_v30 = vmul.f32 0.5, %v568_v56 }
 0x192   : > { %v1054_v2 = vpop.eup %1053  ;;  %v637_v3 = vadd.f32 1.0, %v1052_v1  ;;  %1065 = verf.f32 %v608_v53 }
 0x193   : > { %v1056_v4 = vpop.eup %1055  ;;  %v635_v5 = vadd.f32 1.0, %v1054_v2  ;;  %915 = vmatpush3.bf16.msra.mxu1 %v662_v60 }
 0x194   : > { %v1058_v7 = vpop.eup %1057  ;;  %v638_v10 = vadd.f32 1.0, %v1056_v4  ;;  %916 = vmatprep.subr.bf16.mxu1 %v1295_v27  ;;  %v653_v15 = vmul.f32 %v637_v3, %v589_v8 }
 0x195   : > { %v636_v14 = vadd.f32 1.0, %v1058_v7  ;;  %v651_v18 = vmul.f32 %v635_v5, %v587_v11 }
 0x196   : > { %v654_v16 = vmul.f32 %v638_v10, %v590_v9 }
 0x197   : > { %v652_v19 = vmul.f32 %v636_v14, %v588_v13  ;;  %917 = vmatpush3.bf16.msra.mxu1 %v663_v0 }
 0x198   : > { %v665_v20 = vpack.c.bf16 %v654_v16, %v653_v15  ;;  %918 = vmatprep.subr.bf16.mxu1 %v1295_v27 }
 0x199   : > { %v1060_v21 = vpop.eup %1059  ;;  %v664_v6 = vpack.c.bf16 %v652_v19, %v651_v18 }
 0x19a   : > { %v1062_v17 = vpop.eup %1061  ;;  %v641_v22 = vadd.f32 1.0, %v1060_v21 }
 0x19b   : > { %v1064_v24 = vpop.eup %1063  ;;  %v639_v25 = vadd.f32 1.0, %v1062_v17  ;;  %919 = vmatpush3.bf16.msra.mxu1 %v664_v6 }
 0x19c   : > { %v1066_v12 = vpop.eup %1065  ;;  %v642_v28 = vadd.f32 1.0, %v1064_v24  ;;  %920 = vmatprep.subr.bf16.mxu1 %v1295_v27  ;;  %v657_v32 = vmul.f32 %v641_v22, %v593_v23 }
 0x19d   : > { %v640_v31 = vadd.f32 1.0, %v1066_v12  ;;  %v655_v34 = vmul.f32 %v639_v25, %v591_v29 }
 0x19e   : > { %v658_v33 = vmul.f32 %v642_v28, %v594_v26 }
 0x19f   : > { %v656_v35 = vmul.f32 %v640_v31, %v592_v30  ;;  %921 = vmatpush3.bf16.msra.mxu1 %v665_v20 }
 0x1a0   : > { %922 = vmatprep.subr.bf16.mxu1 %v1295_v27  ;;  %v667_v36 = vpack.c.bf16 %v658_v33, %v657_v32 }
 0x1a1   : > { %v666_v37 = vpack.c.bf16 %v656_v35, %v655_v34 }
 0x1a3   : > { %923 = vmatpush3.bf16.msra.mxu1 %v666_v37 }
 0x1a4   : > { %924 = vmatprep.subr.bf16.mxu1 %v1295_v27 }
 0x1a7   : > { %925 = vmatpush3.bf16.msra.mxu1 %v667_v36 }
 0x1aa   : > { %927 = vmatmul.mubr.bf16.vlgmr.msra.gmra.mrb[0].mxu1 %v659_v38 }
 0x27d   : > { %v708_v40 = vpop.f32.mrb[0].mxu1 }
 0x27e   : > { %v709_v41 = vadd.f32 %v708_v40, %v672_v39  ;;  %v928_v42 = vpop.f32.mrb[1].mxu1 }
 0x27f   : > { %v711_v27 = vpop.f32.mrb[2].mxu1 }
 0x280   : > { %714 = vst [vmem:[%s295_s27] sm:$0xf] %v709_v41  ;;  %v929_v43 = vpop.f32.mrb[3].mxu1 }
 0x281   : > { %1222 = shalt.err (!%p1219_p13)
}
 0x282   : > { %s1223_s23 = scalar_lea.hbm %s1605_s28, 64  ;;  %s1227_s13 = scalar_lea.hbm %s1654_s5, 128 }
 0x283   : > { %p1224_p9 = scmp.ne.s32.totalorder %s1605_s28, %s1223_s23  ;;  %p1228_p11 = scmp.lt.u32.totalorder %s1605_s28, %s1654_s5 }
 0x284   : > { %p1229_p8 = scmp.lt.u32.totalorder %s1227_s13, %s1223_s23  ;;  %p1231_p3 = scmp.lt.u32.totalorder %s1223_s23, %s1605_s28 }
 0x285   : > { %p1225_p0 = pnand %p1224_p9, %p1492_p10 }
 0x286   : > { %p1230_p6 = por %p1229_p8, %p1228_p11 }
 0x287   : > { %p1226_p4 = pneg %p1225_p0 }
 0x288   : > { %p1232_p5 = por %p1231_p3, %p1230_p6 }
 0x28a   : > { %p1233_p7 = pnand %p1232_p5, %p1226_p4 }
 0x28c   : > { %1236 = shalt.err (!%p1233_p7)
}
 0x28d   : > { %948 = dma.vmem_to_hbm [thread:$0]  (%p1492_p10), %s1607_s6, 64, %s1605_s28, %s716_s22  }
 0x28e PF: > { %s741_s26 = sand.u32 1, %s1271_s18   ;;  %p1674_p12 = scmp.ne.s32.totalorder %s1660_s25, 0 }
 0x28f   : > { %p1675_p1 = scmp.ge.s32.totalorder %s1283_s21, 2  ;;  %s742_s27 = scalar_lea.sflag [#allocation4], %s741_s26 }
 0x291   : > { %p968_p2 = pnand %p1675_p1, %p1674_p12 }
 0x293   : > { %1266 = dma.done.wait (!%p968_p2), %s742_s27, 64  }
 0x294   : > { %1268 = vsyncadd (!%p968_p2), %s742_s27, 4294967232  ;;  %p20_p13 = scmp.ge.s32.totalorder %s1482_s14, 4   ;;  %s1676_s18 = smov %s1275_s19 }
 0x295   : > { %s1677_s19 = smov %s1279_s20  ;;  %s1678_s20 = smov %s1498_s7 }
 0x296   : > { %s1679_s21 = smov %s1482_s14  ;;  %22 = sbr.rel (!%p20_p13) target bundleno = 7 (0x7), region = 101 }
 0x29d   :  { %747 = vsyncpa [#allocation3], 1 }
 0x29e   :  { %749 = vsyncpa [#allocation3 + $0x1], 1 }
 0x29f   :  { %750 = vsyncpa [#allocation6], 1 }
 0x2a0   :  { %751 = vsyncpa [#allocation9], 1 }
 0x2a1   :  { %752 = vsyncpa [#allocation4], 1 }
 0x2a2   :  { %754 = vsyncpa [#allocation4 + $0x1], 1 }

</bundles_post_ra>
